<compile_context>
chip_gen: v6e
topology: v6e:2x2x1
jax: 0.10.0
libtpu: 0.0.40
codegen_flags: <defaults>
</compile_context>

<pallas_src>
import functools

import jax
import jax.numpy as jnp
from jax import lax
from jax.experimental import pallas as pl
from jax.experimental.pallas import tpu as pltpu


# ------------------------------ fused kernel --------------------------------

def _fused_forward_kernel(x_ref, w_ref, v_ref, o_ref, *,
                          conv_layers, dense_layer, k, mxu_dtype):
    """Whole ConvUpdater forward for a block of Mb sample rows.

    x_ref : (Mb, T, Cin0)             input activations (f32)
    w_ref : (L, KCin_max, Cout_max)   all conv weights (block-diag densified,
                                      tap-major im2col layout) + dense weight,
                                      bf16, zero-padded
    v_ref : (R, Cvec_max)             all bias / gamma / beta / dense-bias rows (f32)
    o_ref : (Mb, T, Do)               output block

    conv_layers : tuple of (w_idx, cin, cout, bias_row, gamma_row, beta_row, norm)
    dense_layer : (w_idx, cf, do, bias_row)
    All schedule entries are static Python ints/bools -> fully unrolled.
    """
    mb, t, _ = x_ref.shape
    pad = k // 2
    rows = mb * t

    def conv_layer(cur, wi, cin, cout, brow, grow, berow, do_norm):
        assert cur.shape[-1] == cin
        # "same" zero halo along T, kept entirely in vregs (no scratch buffer).
        zhalo = jnp.zeros((mb, pad, cin), jnp.float32)
        padded = jnp.concatenate([zhalo, cur, zhalo], axis=1)        # (mb, t+2p, cin)
        # im2col: fold the K taps into the contraction dim with a vreg concat
        # (no VMEM round trip), then ONE dense MXU dot for the whole layer —
        # groups are block-diagonal zeros inside the densified weight.
        slab = jnp.concatenate([padded[:, j:j + t, :] for j in range(k)], axis=-1)
        slab = slab.reshape(rows, k * cin).astype(mxu_dtype)
        w = w_ref[wi, :k * cin, :cout]                                # bf16
        y = jnp.dot(slab, w, preferred_element_type=jnp.float32)      # (rows, cout)
        y = y + v_ref[brow:brow + 1, :cout]                           # conv bias
        y = y.reshape(mb, t, cout)

        if do_norm:
            # GroupNorm(1, C): per-sample stats over (T, C), single pass
            # (sum and sum-of-squares -> mean, E[x^2] - mean^2).
            inv_n = 1.0 / float(t * cout)
            s = jnp.sum(jnp.sum(y, axis=2, keepdims=True), axis=1, keepdims=True)
            s2 = jnp.sum(jnp.sum(y * y, axis=2, keepdims=True), axis=1, keepdims=True)
            mean = s * inv_n
            var = s2 * inv_n - mean * mean
            y = (y - mean) * lax.rsqrt(var + 1e-5)
            y = (y * v_ref[grow:grow + 1, :cout].reshape(1, 1, cout)
                 + v_ref[berow:berow + 1, :cout].reshape(1, 1, cout))

        return jnp.maximum(y, 0.0)                                     # ReLU

    cur = x_ref[...].astype(jnp.float32)
    # first conv (+ReLU, no norm) and the n_blocks basic blocks, statically unrolled.
    for (wi, cin, cout, brow, grow, berow, do_norm) in conv_layers:
        cur = conv_layer(cur, wi, cin, cout, brow, grow, berow, do_norm)

    # final_relu: ReLU(ReLU(x)) == ReLU(x) -> already satisfied.
    wi, cf, do, brow = dense_layer
    res = jnp.dot(cur.reshape(rows, cf).astype(mxu_dtype),
                  w_ref[wi, :cf, :do],
                  preferred_element_type=jnp.float32)
    res = (res + v_ref[brow:brow + 1, :do]).reshape(mb, t, do)
    # NOTE: for configs where T*Do is large, flatten this store to a lane-dense
    # (Mb, T*Do) out block; at T*Do = 64 (~2 KB writeback) the 3-D store is kept.
    o_ref[...] = res.astype(o_ref.dtype)


# ------------------------------- wrapper -------------------------------------

def _pt_conv_to_dense_im2col(w_pt, groups):
    """PyTorch Conv1d weight (Cout, Cin//g, K) -> dense block-diagonal
    (K*Cin, Cout) matrix in tap-major im2col layout:
    row j*Cin + c  <->  (tap j, input channel c)."""
    cout, cin_g, k = w_pt.shape
    cin = cin_g * groups
    cout_g = cout // groups
    w = jnp.zeros((k, cin, cout), w_pt.dtype)
    for g in range(groups):
        blk = jnp.transpose(w_pt[g * cout_g:(g + 1) * cout_g], (2, 1, 0))  # (K, Cin_g, Cout_g)
        w = w.at[:, g * cin_g:(g + 1) * cin_g, g * cout_g:(g + 1) * cout_g].set(blk)
    return w.reshape(k * cin, cout)


def _grid_splits(m_rows):
    """2-way 'parallel' grid split only where it shards across TensorCores
    (v7x has 2 TCs/chip).  On single-TC v5e/v6e the grid is a sequential loop,
    so splitting only adds per-step overhead and halves MXU row fill."""
    try:
        kind = jax.devices()[0].device_kind.lower()
    except Exception:
        return 1
    two_tc = ("v7" in kind) or ("7x" in kind)
    return 2 if (two_tc and m_rows % 2 == 0 and m_rows >= 2) else 1


def conv_updater_forward(x, params, *, use_norm, groups, kernel_size,
                         mxu_dtype=jnp.bfloat16):
    """x: (B, T, N, C) -> (B, T, N, output_dim).  One fused pallas_call."""
    B, T, N, C = x.shape
    K = kernel_size
    assert K % 2 == 1, "even kernel_size changes output length in PyTorch Conv1d(padding=K//2)"
    M = B * N
    Do = params["dense_b"].shape[0]

    # rearrange 'b t n c -> (b n) t c' (channels-last instead of NCW).
    # TODO(synk): for large B*T*N*C fold this transpose into the kernel grid
    #             (index over (b, n)) instead of a separate HBM pass.
    xm = jnp.transpose(x, (0, 2, 1, 3)).reshape(M, T, C)

    # ---- pack every weight into ONE zero-padded bf16 tensor and every
    # ---- per-layer vector into ONE f32 matrix (3 input DMAs total).
    conv_ws = [_pt_conv_to_dense_im2col(params["first_w_pt"], 1)]
    conv_dims = [(params["first_w_pt"].shape[1], params["first_w_pt"].shape[0])]
    for (w_pt, _b, _g, _be) in params["blocks"]:
        conv_ws.append(_pt_conv_to_dense_im2col(w_pt, groups))
        conv_dims.append((w_pt.shape[1] * groups, w_pt.shape[0]))
    dense_w = params["dense_w"]                       # (Cf, Do) == Linear.weight.T
    Cf = dense_w.shape[0]

    n_w = len(conv_ws) + 1
    kc_max = max([w.shape[0] for w in conv_ws] + [Cf])
    co_max = max([w.shape[1] for w in conv_ws] + [Do])
    w_all = jnp.zeros((n_w, kc_max, co_max), mxu_dtype)
    for i, w in enumerate(conv_ws):
        w_all = w_all.at[i, :w.shape[0], :w.shape[1]].set(w.astype(mxu_dtype))
    w_all = w_all.at[n_w - 1, :Cf, :Do].set(dense_w.astype(mxu_dtype))

    vec_list = [params["first_b"]]
    for (_w, b, g, be) in params["blocks"]:
        vec_list += [b, g, be]
    vec_list.append(params["dense_b"])
    n_vec = len(vec_list)
    c_vec = max(v.shape[0] for v in vec_list)
    vecs = jnp.zeros((n_vec, c_vec), jnp.float32)
    for i, v in enumerate(vec_list):
        vecs = vecs.at[i, :v.shape[0]].set(v.astype(jnp.float32))

    # static per-layer schedule handed to the kernel
    conv_layers = [(0, conv_dims[0][0], conv_dims[0][1], 0, -1, -1, False)]
    for i in range(len(params["blocks"])):
        cin, cout = conv_dims[i + 1]
        conv_layers.append((i + 1, cin, cout, 1 + 3 * i, 2 + 3 * i, 3 + 3 * i,
                            bool(use_norm)))
    dense_layer = (n_w - 1, Cf, Do, n_vec - 1)

    nb = _grid_splits(M)
    Mb = M // nb

    kernel = functools.partial(_fused_forward_kernel,
                               conv_layers=tuple(conv_layers),
                               dense_layer=dense_layer, k=K, mxu_dtype=mxu_dtype)

    out = pl.pallas_call(
        kernel,
        out_shape=jax.ShapeDtypeStruct((M, T, Do), x.dtype),
        grid_spec=pltpu.PrefetchScalarGridSpec(
            num_scalar_prefetch=0,
            grid=(nb,),
            in_specs=[
                pl.BlockSpec((Mb, T, C), lambda m: (m, 0, 0)),
                pl.BlockSpec((n_w, kc_max, co_max), lambda m: (0, 0, 0)),
                pl.BlockSpec((n_vec, c_vec), lambda m: (0, 0)),
            ],
            out_specs=pl.BlockSpec((Mb, T, Do), lambda m: (m, 0, 0)),
        ),
        compiler_params=pltpu.CompilerParams(
            dimension_semantics=("parallel",),
            vmem_limit_bytes=32 * 1024 * 1024,
        ),
    )(xm, w_all, vecs)

    # rearrange '(b n) t c -> b t n c'
    return out.reshape(B, N, T, Do).transpose(0, 2, 1, 3)


# ------------------------- parameter construction ---------------------------

def channel_schedule(base_filters, n_blocks, increasefilter_gap):
    chans = []
    out_channels = base_filters
    for i_block in range(n_blocks):
        if i_block == 0:
            in_c = base_filters
            out_c = in_c
        else:
            in_c = int(base_filters * 2 ** ((i_block - 1) // increasefilter_gap))
            if i_block % increasefilter_gap == 0 and i_block != 0:
                out_c = in_c * 2
            else:
                out_c = in_c
        chans.append((in_c, out_c))
        out_channels = out_c
    return chans, out_channels


def init_params(key, cfg):
    K = cfg["kernel_size"]
    bf = cfg["base_filters"]
    g = cfg["groups"]
    chans, out_c = channel_schedule(bf, cfg["n_blocks"], cfg["increasefilter_gap"])
    params = {}
    key, k1, k2 = jax.random.split(key, 3)
    # first_block_conv (groups=1), PyTorch weight layout (Cout, Cin, K)
    params["first_w_pt"] = 0.1 * jax.random.normal(k1, (bf, cfg["input_dim"], K), jnp.float32)
    params["first_b"] = 0.1 * jax.random.normal(k2, (bf,), jnp.float32)
    blocks = []
    for (ci, co) in chans:
        key, kw, kb = jax.random.split(key, 3)
        blocks.append((0.1 * jax.random.normal(kw, (co, ci // g, K), jnp.float32),
                       0.1 * jax.random.normal(kb, (co,), jnp.float32),
                       jnp.ones((co,), jnp.float32),      # GroupNorm gamma
                       jnp.zeros((co,), jnp.float32)))    # GroupNorm beta
    params["blocks"] = blocks
    key, kw, kb = jax.random.split(key, 3)
    # JAX layout (Cf, Do) == transpose of nn.Linear.weight
    params["dense_w"] = 0.1 * jax.random.normal(kw, (out_c, cfg["output_dim"]), jnp.float32)
    params["dense_b"] = 0.1 * jax.random.normal(kb, (cfg["output_dim"],), jnp.float32)
    return params


# ----------------------------- pure-JAX reference ---------------------------

def ref_forward(x, params, *, use_norm, groups, kernel_size):
    """Independent reference using lax.conv on the PyTorch-layout weights."""
    B, T, N, C = x.shape
    pad = kernel_size // 2
    xm = jnp.transpose(x, (0, 2, 3, 1)).reshape(B * N, C, T)      # '(b n) c t'

    def conv1d(h, w_pt, b, fg):
        y = lax.conv_general_dilated(h, w_pt, window_strides=(1,),
                                     padding=[(pad, pad)],
                                     dimension_numbers=("NCH", "OIH", "NCH"),
                                     feature_group_count=fg)
        return y + b[None, :, None]

    def gnorm(h, gamma, beta):
        mean = jnp.mean(h, axis=(1, 2), keepdims=True)
        var = jnp.mean((h - mean) ** 2, axis=(1, 2), keepdims=True)
        h = (h - mean) * lax.rsqrt(var + 1e-5)
        return h * gamma[None, :, None] + beta[None, :, None]

    h = jnp.maximum(conv1d(xm, params["first_w_pt"], params["first_b"], 1), 0.0)
    for (w_pt, b, gamma, beta) in params["blocks"]:
        h = conv1d(h, w_pt, b, groups)
        if use_norm:
            h = gnorm(h, gamma, beta)
        h = jnp.maximum(h, 0.0)
    h = jnp.maximum(h, 0.0)                                        # final_relu (no-op)
    Cf = h.shape[1]
    feat = h.reshape(B, N, Cf, T).transpose(0, 3, 1, 2)            # 'b t n c'
    return feat @ params["dense_w"] + params["dense_b"]


# --------------------------------- main --------------------------------------

if __name__ == "__main__":
    cfg = dict(input_dim=4, base_filters=8, output_dim=4, n_blocks=2,
               kernel_size=3, increasefilter_gap=1, groups=2,
               use_norm=True, use_dropout=False)
    B, T, N = 2, 16, 4

    key = jax.random.PRNGKey(0)
    key, kx = jax.random.split(key)
    x = jax.random.normal(kx, (B, T, N, cfg["input_dim"]), jnp.float32)
    params = init_params(key, cfg)

    fwd = jax.jit(functools.partial(conv_updater_forward,
                                    use_norm=cfg["use_norm"],
                                    groups=cfg["groups"],
                                    kernel_size=cfg["kernel_size"]))
    out = jax.block_until_ready(fwd(x, params))
    assert out.shape == (B, T, N, cfg["output_dim"]), out.shape

    ref = jax.block_until_ready(
        ref_forward(x, params, use_norm=cfg["use_norm"],
                    groups=cfg["groups"], kernel_size=cfg["kernel_size"]))
    err = float(jnp.max(jnp.abs(out - ref)))
    # bf16 MXU operands (f32 accumulation) vs full-f32 reference -> loosened tol.
    assert jnp.allclose(out, ref, atol=5e-2, rtol=5e-2), err

    print("KERNEL_OK")
</pallas_src>

<mosaic_0001>
module attributes {stable_mosaic.version = 11 : i64} {
  func.func @_fused_forward_kernel(%arg0: i32, %arg1: memref<8x16x4xf32, #tpu.memory_space<vmem>>, %arg2: memref<4x24x16xbf16, #tpu.memory_space<vmem>>, %arg3: memref<8x16xf32, #tpu.memory_space<vmem>>, %arg4: memref<8x16x4xf32, #tpu.memory_space<vmem>>) attributes {dimension_semantics = [#tpu.dimension_semantics<parallel>], iteration_bounds = array<i64: 1>, scalar_prefetch = 0 : i64, scratch_operands = 0 : i64, tpu.core_type = #tpu.core_type<tc>, window_params = [{transform_indices = @transform_0, window_bounds = array<i64: 8, 16, 4>}, {pipeline_mode = #tpu.pipeline_mode<synchronous>, transform_indices = @transform_1, window_bounds = array<i64: 4, 24, 16>}, {pipeline_mode = #tpu.pipeline_mode<synchronous>, transform_indices = @transform_2, window_bounds = array<i64: 8, 16>}, {transform_indices = @transform_3, window_bounds = array<i64: 8, 16, 4>}]} {
    %c0 = arith.constant 0 : index
    %c0_0 = arith.constant 0 : index
    %c0_1 = arith.constant 0 : index
    %0 = vector.load %arg1[%c0, %c0_0, %c0_1] : memref<8x16x4xf32, #tpu.memory_space<vmem>>, vector<8x16x4xf32>
    %cst = arith.constant 0.000000e+00 : f32
    %1 = vector.broadcast %cst : f32 to vector<8x1x4xf32>
    %2 = tpu.concatenate %1, %0, %1 in 1 : vector<8x1x4xf32>, vector<8x16x4xf32>, vector<8x1x4xf32> -> vector<8x18x4xf32>
    %3 = vector.extract_strided_slice %2 {offsets = [0, 0, 0], sizes = [8, 16, 4], strides = [1, 1, 1]} : vector<8x18x4xf32> to vector<8x16x4xf32>
    %4 = vector.extract_strided_slice %2 {offsets = [0, 1, 0], sizes = [8, 16, 4], strides = [1, 1, 1]} : vector<8x18x4xf32> to vector<8x16x4xf32>
    %5 = vector.extract_strided_slice %2 {offsets = [0, 2, 0], sizes = [8, 16, 4], strides = [1, 1, 1]} : vector<8x18x4xf32> to vector<8x16x4xf32>
    %6 = tpu.concatenate %3, %4, %5 in 2 : vector<8x16x4xf32>, vector<8x16x4xf32>, vector<8x16x4xf32> -> vector<8x16x12xf32>
    %7 = vector.shape_cast %6 : vector<8x16x12xf32> to vector<128x12xf32>
    %8 = arith.truncf %7 : vector<128x12xf32> to vector<128x12xbf16>
    %c0_2 = arith.constant 0 : index
    %c0_3 = arith.constant 0 : index
    %c0_4 = arith.constant 0 : index
    %9 = vector.load %arg2[%c0_2, %c0_3, %c0_4] : memref<4x24x16xbf16, #tpu.memory_space<vmem>>, vector<1x12x8xbf16>
    %10 = vector.shape_cast %9 : vector<1x12x8xbf16> to vector<12x8xbf16>
    %cst_5 = arith.constant dense<0.000000e+00> : vector<128x8xf32>
    %11 = tpu.matmul %8, %10, %cst_5 {dimension_numbers = #tpu.dot_dimension_numbers<[1], [0], [0], [1], [0, 0, 1, 1], [], []>} : vector<128x12xbf16>, vector<12x8xbf16>, vector<128x8xf32> -> vector<128x8xf32>
    %c0_6 = arith.constant 0 : index
    %c0_7 = arith.constant 0 : index
    %12 = vector.load %arg3[%c0_6, %c0_7] : memref<8x16xf32, #tpu.memory_space<vmem>>, vector<1x8xf32>
    %13 = vector.broadcast %12 : vector<1x8xf32> to vector<128x8xf32>
    %14 = arith.addf %11, %13 : vector<128x8xf32>
    %15 = vector.shape_cast %14 : vector<128x8xf32> to vector<8x16x8xf32>
    %cst_8 = arith.constant 0.000000e+00 : f32
    %16 = vector.broadcast %cst_8 : f32 to vector<8x16x8xf32>
    %17 = arith.maximumf %15, %16 : vector<8x16x8xf32>
    %cst_9 = arith.constant 0.000000e+00 : f32
    %18 = vector.broadcast %cst_9 : f32 to vector<8x1x8xf32>
    %19 = tpu.concatenate %18, %17, %18 in 1 : vector<8x1x8xf32>, vector<8x16x8xf32>, vector<8x1x8xf32> -> vector<8x18x8xf32>
    %20 = vector.extract_strided_slice %19 {offsets = [0, 0, 0], sizes = [8, 16, 8], strides = [1, 1, 1]} : vector<8x18x8xf32> to vector<8x16x8xf32>
    %21 = vector.extract_strided_slice %19 {offsets = [0, 1, 0], sizes = [8, 16, 8], strides = [1, 1, 1]} : vector<8x18x8xf32> to vector<8x16x8xf32>
    %22 = vector.extract_strided_slice %19 {offsets = [0, 2, 0], sizes = [8, 16, 8], strides = [1, 1, 1]} : vector<8x18x8xf32> to vector<8x16x8xf32>
    %23 = tpu.concatenate %20, %21, %22 in 2 : vector<8x16x8xf32>, vector<8x16x8xf32>, vector<8x16x8xf32> -> vector<8x16x24xf32>
    %24 = vector.shape_cast %23 : vector<8x16x24xf32> to vector<128x24xf32>
    %25 = arith.truncf %24 : vector<128x24xf32> to vector<128x24xbf16>
    %c1 = arith.constant 1 : index
    %c0_10 = arith.constant 0 : index
    %c0_11 = arith.constant 0 : index
    %26 = vector.load %arg2[%c1, %c0_10, %c0_11] : memref<4x24x16xbf16, #tpu.memory_space<vmem>>, vector<1x24x8xbf16>
    %27 = vector.shape_cast %26 : vector<1x24x8xbf16> to vector<24x8xbf16>
    %cst_12 = arith.constant dense<0.000000e+00> : vector<128x8xf32>
    %28 = tpu.matmul %25, %27, %cst_12 {dimension_numbers = #tpu.dot_dimension_numbers<[1], [0], [0], [1], [0, 0, 1, 1], [], []>} : vector<128x24xbf16>, vector<24x8xbf16>, vector<128x8xf32> -> vector<128x8xf32>
    %c1_13 = arith.constant 1 : index
    %c0_14 = arith.constant 0 : index
    %29 = vector.load %arg3[%c1_13, %c0_14] : memref<8x16xf32, #tpu.memory_space<vmem>>, vector<1x8xf32>
    %30 = vector.broadcast %29 : vector<1x8xf32> to vector<128x8xf32>
    %31 = arith.addf %28, %30 : vector<128x8xf32>
    %32 = vector.shape_cast %31 : vector<128x8xf32> to vector<8x16x8xf32>
    %cst_15 = arith.constant dense<0.000000e+00> : vector<8x16xf32>
    %33 = vector.multi_reduction <add>, %32, %cst_15 [2] : vector<8x16x8xf32> to vector<8x16xf32>
    %34 = vector.shape_cast %33 : vector<8x16xf32> to vector<8x16x1xf32>
    %cst_16 = arith.constant dense<0.000000e+00> : vector<8x1xf32>
    %35 = vector.multi_reduction <add>, %34, %cst_16 [1] : vector<8x16x1xf32> to vector<8x1xf32>
    %36 = vector.shape_cast %35 : vector<8x1xf32> to vector<8x1x1xf32>
    %37 = arith.mulf %32, %32 : vector<8x16x8xf32>
    %cst_17 = arith.constant dense<0.000000e+00> : vector<8x16xf32>
    %38 = vector.multi_reduction <add>, %37, %cst_17 [2] : vector<8x16x8xf32> to vector<8x16xf32>
    %39 = vector.shape_cast %38 : vector<8x16xf32> to vector<8x16x1xf32>
    %cst_18 = arith.constant dense<0.000000e+00> : vector<8x1xf32>
    %40 = vector.multi_reduction <add>, %39, %cst_18 [1] : vector<8x16x1xf32> to vector<8x1xf32>
    %41 = vector.shape_cast %40 : vector<8x1xf32> to vector<8x1x1xf32>
    %cst_19 = arith.constant 7.812500e-03 : f32
    %42 = vector.broadcast %cst_19 : f32 to vector<8x1x1xf32>
    %43 = arith.mulf %36, %42 : vector<8x1x1xf32>
    %cst_20 = arith.constant 7.812500e-03 : f32
    %44 = vector.broadcast %cst_20 : f32 to vector<8x1x1xf32>
    %45 = arith.mulf %41, %44 : vector<8x1x1xf32>
    %46 = arith.mulf %43, %43 : vector<8x1x1xf32>
    %47 = arith.subf %45, %46 : vector<8x1x1xf32>
    %48 = vector.broadcast %43 : vector<8x1x1xf32> to vector<8x16x8xf32>
    %49 = arith.subf %32, %48 : vector<8x16x8xf32>
    %cst_21 = arith.constant 9.99999974E-6 : f32
    %50 = vector.broadcast %cst_21 : f32 to vector<8x1x1xf32>
    %51 = arith.addf %47, %50 : vector<8x1x1xf32>
    %52 = math.rsqrt %51 : vector<8x1x1xf32>
    %53 = vector.broadcast %52 : vector<8x1x1xf32> to vector<8x16x8xf32>
    %54 = arith.mulf %49, %53 : vector<8x16x8xf32>
    %c2 = arith.constant 2 : index
    %c0_22 = arith.constant 0 : index
    %55 = vector.load %arg3[%c2, %c0_22] : memref<8x16xf32, #tpu.memory_space<vmem>>, vector<1x8xf32>
    %56 = vector.shape_cast %55 : vector<1x8xf32> to vector<1x1x8xf32>
    %57 = vector.broadcast %56 : vector<1x1x8xf32> to vector<8x16x8xf32>
    %58 = arith.mulf %54, %57 : vector<8x16x8xf32>
    %c3 = arith.constant 3 : index
    %c0_23 = arith.constant 0 : index
    %59 = vector.load %arg3[%c3, %c0_23] : memref<8x16xf32, #tpu.memory_space<vmem>>, vector<1x8xf32>
    %60 = vector.shape_cast %59 : vector<1x8xf32> to vector<1x1x8xf32>
    %61 = vector.broadcast %60 : vector<1x1x8xf32> to vector<8x16x8xf32>
    %62 = arith.addf %58, %61 : vector<8x16x8xf32>
    %cst_24 = arith.constant 0.000000e+00 : f32
    %63 = vector.broadcast %cst_24 : f32 to vector<8x16x8xf32>
    %64 = arith.maximumf %62, %63 : vector<8x16x8xf32>
    %cst_25 = arith.constant 0.000000e+00 : f32
    %65 = vector.broadcast %cst_25 : f32 to vector<8x1x8xf32>
    %66 = tpu.concatenate %65, %64, %65 in 1 : vector<8x1x8xf32>, vector<8x16x8xf32>, vector<8x1x8xf32> -> vector<8x18x8xf32>
    %67 = vector.extract_strided_slice %66 {offsets = [0, 0, 0], sizes = [8, 16, 8], strides = [1, 1, 1]} : vector<8x18x8xf32> to vector<8x16x8xf32>
    %68 = vector.extract_strided_slice %66 {offsets = [0, 1, 0], sizes = [8, 16, 8], strides = [1, 1, 1]} : vector<8x18x8xf32> to vector<8x16x8xf32>
    %69 = vector.extract_strided_slice %66 {offsets = [0, 2, 0], sizes = [8, 16, 8], strides = [1, 1, 1]} : vector<8x18x8xf32> to vector<8x16x8xf32>
    %70 = tpu.concatenate %67, %68, %69 in 2 : vector<8x16x8xf32>, vector<8x16x8xf32>, vector<8x16x8xf32> -> vector<8x16x24xf32>
    %71 = vector.shape_cast %70 : vector<8x16x24xf32> to vector<128x24xf32>
    %72 = arith.truncf %71 : vector<128x24xf32> to vector<128x24xbf16>
    %c2_26 = arith.constant 2 : index
    %c0_27 = arith.constant 0 : index
    %c0_28 = arith.constant 0 : index
    %73 = vector.load %arg2[%c2_26, %c0_27, %c0_28] : memref<4x24x16xbf16, #tpu.memory_space<vmem>>, vector<1x24x16xbf16>
    %74 = vector.shape_cast %73 : vector<1x24x16xbf16> to vector<24x16xbf16>
    %cst_29 = arith.constant dense<0.000000e+00> : vector<128x16xf32>
    %75 = tpu.matmul %72, %74, %cst_29 {dimension_numbers = #tpu.dot_dimension_numbers<[1], [0], [0], [1], [0, 0, 1, 1], [], []>} : vector<128x24xbf16>, vector<24x16xbf16>, vector<128x16xf32> -> vector<128x16xf32>
    %c4 = arith.constant 4 : index
    %c0_30 = arith.constant 0 : index
    %76 = vector.load %arg3[%c4, %c0_30] : memref<8x16xf32, #tpu.memory_space<vmem>>, vector<1x16xf32>
    %77 = vector.broadcast %76 : vector<1x16xf32> to vector<128x16xf32>
    %78 = arith.addf %75, %77 : vector<128x16xf32>
    %79 = vector.shape_cast %78 : vector<128x16xf32> to vector<8x16x16xf32>
    %cst_31 = arith.constant dense<0.000000e+00> : vector<8x16xf32>
    %80 = vector.multi_reduction <add>, %79, %cst_31 [2] : vector<8x16x16xf32> to vector<8x16xf32>
    %81 = vector.shape_cast %80 : vector<8x16xf32> to vector<8x16x1xf32>
    %cst_32 = arith.constant dense<0.000000e+00> : vector<8x1xf32>
    %82 = vector.multi_reduction <add>, %81, %cst_32 [1] : vector<8x16x1xf32> to vector<8x1xf32>
    %83 = vector.shape_cast %82 : vector<8x1xf32> to vector<8x1x1xf32>
    %84 = arith.mulf %79, %79 : vector<8x16x16xf32>
    %cst_33 = arith.constant dense<0.000000e+00> : vector<8x16xf32>
    %85 = vector.multi_reduction <add>, %84, %cst_33 [2] : vector<8x16x16xf32> to vector<8x16xf32>
    %86 = vector.shape_cast %85 : vector<8x16xf32> to vector<8x16x1xf32>
    %cst_34 = arith.constant dense<0.000000e+00> : vector<8x1xf32>
    %87 = vector.multi_reduction <add>, %86, %cst_34 [1] : vector<8x16x1xf32> to vector<8x1xf32>
    %88 = vector.shape_cast %87 : vector<8x1xf32> to vector<8x1x1xf32>
    %cst_35 = arith.constant 3.906250e-03 : f32
    %89 = vector.broadcast %cst_35 : f32 to vector<8x1x1xf32>
    %90 = arith.mulf %83, %89 : vector<8x1x1xf32>
    %cst_36 = arith.constant 3.906250e-03 : f32
    %91 = vector.broadcast %cst_36 : f32 to vector<8x1x1xf32>
    %92 = arith.mulf %88, %91 : vector<8x1x1xf32>
    %93 = arith.mulf %90, %90 : vector<8x1x1xf32>
    %94 = arith.subf %92, %93 : vector<8x1x1xf32>
    %95 = vector.broadcast %90 : vector<8x1x1xf32> to vector<8x16x16xf32>
    %96 = arith.subf %79, %95 : vector<8x16x16xf32>
    %cst_37 = arith.constant 9.99999974E-6 : f32
    %97 = vector.broadcast %cst_37 : f32 to vector<8x1x1xf32>
    %98 = arith.addf %94, %97 : vector<8x1x1xf32>
    %99 = math.rsqrt %98 : vector<8x1x1xf32>
    %100 = vector.broadcast %99 : vector<8x1x1xf32> to vector<8x16x16xf32>
    %101 = arith.mulf %96, %100 : vector<8x16x16xf32>
    %c5 = arith.constant 5 : index
    %c0_38 = arith.constant 0 : index
    %102 = vector.load %arg3[%c5, %c0_38] : memref<8x16xf32, #tpu.memory_space<vmem>>, vector<1x16xf32>
    %103 = vector.shape_cast %102 : vector<1x16xf32> to vector<1x1x16xf32>
    %104 = vector.broadcast %103 : vector<1x1x16xf32> to vector<8x16x16xf32>
    %105 = arith.mulf %101, %104 : vector<8x16x16xf32>
    %c6 = arith.constant 6 : index
    %c0_39 = arith.constant 0 : index
    %106 = vector.load %arg3[%c6, %c0_39] : memref<8x16xf32, #tpu.memory_space<vmem>>, vector<1x16xf32>
    %107 = vector.shape_cast %106 : vector<1x16xf32> to vector<1x1x16xf32>
    %108 = vector.broadcast %107 : vector<1x1x16xf32> to vector<8x16x16xf32>
    %109 = arith.addf %105, %108 : vector<8x16x16xf32>
    %cst_40 = arith.constant 0.000000e+00 : f32
    %110 = vector.broadcast %cst_40 : f32 to vector<8x16x16xf32>
    %111 = arith.maximumf %109, %110 : vector<8x16x16xf32>
    %112 = vector.shape_cast %111 : vector<8x16x16xf32> to vector<128x16xf32>
    %113 = arith.truncf %112 : vector<128x16xf32> to vector<128x16xbf16>
    %c3_41 = arith.constant 3 : index
    %c0_42 = arith.constant 0 : index
    %c0_43 = arith.constant 0 : index
    %114 = vector.load %arg2[%c3_41, %c0_42, %c0_43] : memref<4x24x16xbf16, #tpu.memory_space<vmem>>, vector<1x16x4xbf16>
    %115 = vector.shape_cast %114 : vector<1x16x4xbf16> to vector<16x4xbf16>
    %cst_44 = arith.constant dense<0.000000e+00> : vector<128x4xf32>
    %116 = tpu.matmul %113, %115, %cst_44 {dimension_numbers = #tpu.dot_dimension_numbers<[1], [0], [0], [1], [0, 0, 1, 1], [], []>} : vector<128x16xbf16>, vector<16x4xbf16>, vector<128x4xf32> -> vector<128x4xf32>
    %c7 = arith.constant 7 : index
    %c0_45 = arith.constant 0 : index
    %117 = vector.load %arg3[%c7, %c0_45] : memref<8x16xf32, #tpu.memory_space<vmem>>, vector<1x4xf32>
    %118 = vector.broadcast %117 : vector<1x4xf32> to vector<128x4xf32>
    %119 = arith.addf %116, %118 : vector<128x4xf32>
    %120 = vector.shape_cast %119 : vector<128x4xf32> to vector<8x16x4xf32>
    %c0_46 = arith.constant 0 : index
    %c0_47 = arith.constant 0 : index
    %c0_48 = arith.constant 0 : index
    %121 = vector.load %arg4[%c0_46, %c0_47, %c0_48] : memref<8x16x4xf32, #tpu.memory_space<vmem>>, vector<8x16x4xf32>
    tpu.vector_store %arg4[%c0_46, %c0_47, %c0_48], %120 {strides = array<i32>} : memref<8x16x4xf32, #tpu.memory_space<vmem>>, vector<8x16x4xf32>,
    return
  }
  func.func @transform_0(%arg0: i32) -> (i32, i32, i32) {
    %c0_i32 = arith.constant 0 : i32
    %c0_i32_0 = arith.constant 0 : i32
    %c0_i32_1 = arith.constant 0 : i32
    return %arg0, %c0_i32, %c0_i32_0 : i32, i32, i32
  }
  func.func @transform_1(%arg0: i32) -> (i32, i32, i32) {
    %c0_i32 = arith.constant 0 : i32
    %c0_i32_0 = arith.constant 0 : i32
    %c0_i32_1 = arith.constant 0 : i32
    %c0_i32_2 = arith.constant 0 : i32
    return %c0_i32, %c0_i32_0, %c0_i32_1 : i32, i32, i32
  }
  func.func @transform_2(%arg0: i32) -> (i32, i32) {
    %c0_i32 = arith.constant 0 : i32
    %c0_i32_0 = arith.constant 0 : i32
    %c0_i32_1 = arith.constant 0 : i32
    return %c0_i32, %c0_i32_0 : i32, i32
  }
  func.func @transform_3(%arg0: i32) -> (i32, i32, i32) {
    %c0_i32 = arith.constant 0 : i32
    %c0_i32_0 = arith.constant 0 : i32
    %c0_i32_1 = arith.constant 0 : i32
    return %arg0, %c0_i32, %c0_i32_0 : i32, i32, i32
  }
}

</mosaic_0001>

<bundles_post_ra>
// kernel: conv_updater_forward.1
= control target key start
LH: loop header
LB: loop body
LE: loop exit
PB: predicated region body
PF: predicated region fallthrough
CT: control target
= control target key end

     0   :  { %vm47_vm0 = vcmask 1040384   ;;  %vm128_vm1 = vcmask 1046528   ;;  %vm217_vm2 = vcmask 1045504   ;;  %s2751_s30 = smov 4   ;;  %s2752_s4 = smov 8   ;;  %vm306_vm3 = vcmask 31744   ;;  %s4061_s0 = inlined_call_operand.vmem [shape: f32[8,16,4], index: 0, kind: input, shape index: {}]   ;;  %s4062_s1 = inlined_call_operand.vmem [shape: bf16[4,24,16], index: 1, kind: input, shape index: {}]   ;;  %s4063_s2 = inlined_call_operand.vmem [shape: f32[8,16], index: 2, kind: input, shape index: {}]   ;;  %s4064_s3 = inlined_call_operand.vmem [shape: f32[8,16,4], index: 3, kind: output, shape index: {}]  }
   0x1   :  { %v15_v0 = vld [vmem:[%s4061_s0] sm:$0xff]  ;;  %v16_v1 = vld [vmem:[%s4061_s0 + $0x8] sm:$0xff]  ;;  %v17_v2 = vld [vmem:[%s4061_s0 + $0x10] sm:$0xff]  ;;  %vm323_vm4 = vcmask 64512   ;;  %vm360_vm5 = vcmask 97280   ;;  %s2753_s22 = smov 16  }
   0x2   :  { %v48_v3 = vrot.slane %v15_v0, 7  ;;  %v49_v4 = vrot.slane %v16_v1, 7  ;;  %v18_v5 = vld [vmem:[%s4061_s0 + $0x18] sm:$0xff]  ;;  %v51_v6 = vrot.slane %v17_v2, 7  ;;  %v19_v7 = vld [vmem:[%s4061_s0 + $0x20] sm:$0xff]  ;;  %v20_v8 = vld [vmem:[%s4061_s0 + $0x28] sm:$0xff] }
   0x3   :  { %v52_v9 = vrot.slane %v18_v5, 7  ;;  %v54_v10 = vrot.slane %v19_v7, 7  ;;  %v55_v11 = vrot.slane %v20_v8, 7  ;;  %v21_v28 = vld [vmem:[%s4061_s0 + $0x30] sm:$0xff]  ;;  %v22_v33 = vld [vmem:[%s4061_s0 + $0x38] sm:$0xff]  ;;  %v23_v63 = vld [vmem:[%s4061_s0 + $0x40] sm:$0xff] }
   0x4   :  { %v2793_v12 = vsel %vm47_vm0, %v48_v3, %v49_v4  ;;  %v2796_v13 = vsel %vm47_vm0, 0.0, %v48_v3  ;;  %v104_v14 = vsel %vm47_vm0, %v49_v4, 0.0  ;;  %v2800_v15 = vsel %vm47_vm0, 0.0, %v51_v6  ;;  %v2825_v34 = vld [vmem:[%s4062_s1] sm:$0x3f]   ;;  %v24_v0 = vld [vmem:[%s4061_s0 + $0x48] sm:$0xff] }
   0x5   :  { %v129_v16 = vrot.slane %v2796_v13, 1  ;;  %v130_v17 = vrot.slane %v2793_v12, 1  ;;  %v132_v18 = vrot.slane %v104_v14, 1  ;;  %v218_v19 = vrot.slane %v2796_v13, 2  ;;  %2467 = vmatprep.subr.msk.bf16.mxu0 %vm217_vm2, %v2825_v34  ;;  %v25_v5 = vld [vmem:[%s4061_s0 + $0x50] sm:$0xff] }
   0x6   :  { %v219_v20 = vrot.slane %v2793_v12, 2  ;;  %v221_v21 = vrot.slane %v104_v14, 2  ;;  %v2807_v22 = vsel %vm47_vm0, %v51_v6, %v52_v9  ;;  %v105_v23 = vsel %vm47_vm0, %v52_v9, 0.0 }
   0x7   :  { %v131_v24 = vsel %vm128_vm1, %v129_v16, %v130_v17  ;;  %v133_v25 = vsel %vm128_vm1, %v130_v17, %v132_v18  ;;  %v134_v26 = vrot.slane %v2800_v15, 1  ;;  %v135_v27 = vrot.slane %v2807_v22, 1  ;;  %v26_v17 = vld [vmem:[%s4061_s0 + $0x58] sm:$0xff] }
   0x8   :  { %v2473_v29 = vpack.i.bf16 %v133_v25, %v131_v24  ;;  %v220_v30 = vsel %vm217_vm2, %v218_v19, %v219_v20  ;;  %v222_v31 = vsel %vm217_vm2, %v219_v20, %v221_v21  ;;  %v137_v32 = vrot.slane %v105_v23, 1 }
   0x9   :  { %v2483_v35 = vpack.i.bf16 %v222_v31, %v220_v30  ;;  %v136_v36 = vsel %vm128_vm1, %v134_v26, %v135_v27  ;;  %v223_v37 = vrot.slane %v2800_v15, 2  ;;  %v224_v38 = vrot.slane %v2807_v22, 2 }
   0xa   :  { %2474 = vrot.lane.b32.xlu0 %v2473_v29, %s2751_s30  ;;  %v138_v39 = vsel %vm128_vm1, %v135_v27, %v137_v32  ;;  %v226_v40 = vrot.slane %v105_v23, 2  ;;  %v2833_v41 = vsel %vm47_vm0, %v54_v10, %v55_v11  ;;  %v2836_v42 = vsel %vm47_vm0, 0.0, %v54_v10 }
   0xb   :  { %2484 = vrot.lane.b32.xlu1 %v2483_v35, %s2752_s4  ;;  %v2478_v43 = vpack.i.bf16 %v138_v39, %v136_v36  ;;  %v225_v44 = vsel %vm217_vm2, %v223_v37, %v224_v38  ;;  %v106_v45 = vsel %vm47_vm0, %v55_v11, 0.0  ;;  %v139_v46 = vrot.slane %v2836_v42, 1 }
   0xc   :  { %v227_v47 = vsel %vm217_vm2, %v224_v38, %v226_v40  ;;  %v140_v48 = vrot.slane %v2833_v41, 1  ;;  %v142_v49 = vrot.slane %v106_v45, 1  ;;  %v57_v50 = vrot.slane %v21_v28, 7 }
   0xd   :  { %v2488_v51 = vpack.i.bf16 %v227_v47, %v225_v44  ;;  %v58_v52 = vrot.slane %v22_v33, 7  ;;  %v228_v53 = vrot.slane %v2836_v42, 2  ;;  %v229_v54 = vrot.slane %v2833_v41, 2  ;;  %v28_v47 = vld [vmem:[%s4061_s0 + $0x68] sm:$0xff] }
   0xe   :  { %2479 = vrot.lane.b32.xlu0 %v2478_v43, %s2751_s30  ;;  %v141_v55 = vsel %vm128_vm1, %v139_v46, %v140_v48  ;;  %v143_v56 = vsel %vm128_vm1, %v140_v48, %v142_v49  ;;  %v2852_v57 = vsel %vm47_vm0, 0.0, %v57_v50  ;;  %v231_v58 = vrot.slane %v106_v45, 2  ;;  %v27_v46 = vld [vmem:[%s4061_s0 + $0x60] sm:$0xff] }
   0xf   :  { %2489 = vrot.lane.b32.xlu1 %v2488_v51, %s2752_s4  ;;  %v2493_v59 = vpack.i.bf16 %v143_v56, %v141_v55  ;;  %v2856_v60 = vsel %vm47_vm0, %v57_v50, %v58_v52  ;;  %v107_v61 = vsel %vm47_vm0, %v58_v52, 0.0  ;;  %v144_v62 = vrot.slane %v2852_v57, 1  ;;  %v29_v52 = vld [vmem:[%s4061_s0 + $0x70] sm:$0xff] }
  0x10   :  { %v145_v1 = vrot.slane %v2856_v60, 1  ;;  %v147_v2 = vrot.slane %v107_v61, 1  ;;  %v230_v3 = vsel %vm217_vm2, %v228_v53, %v229_v54  ;;  %v232_v4 = vsel %vm217_vm2, %v229_v54, %v231_v58  ;;  %v30_v53 = vld [vmem:[%s4061_s0 + $0x78] sm:$0xff] }
  0x11   :  { %v2503_v6 = vpack.i.bf16 %v232_v4, %v230_v3  ;;  %v233_v7 = vrot.slane %v2852_v57, 2  ;;  %v234_v8 = vrot.slane %v2856_v60, 2  ;;  %v236_v9 = vrot.slane %v107_v61, 2 }
  0x12   :  { %2494 = vrot.lane.b32.xlu0 %v2493_v59, %s2751_s30  ;;  %v146_v10 = vsel %vm128_vm1, %v144_v62, %v145_v1  ;;  %v148_v11 = vsel %vm128_vm1, %v145_v1, %v147_v2  ;;  %v60_v14 = vrot.slane %v23_v63, 7  ;;  %v61_v16 = vrot.slane %v24_v0, 7 }
  0x13   :  { %v2498_v18 = vpack.i.bf16 %v148_v11, %v146_v10  ;;  %v235_v19 = vsel %vm217_vm2, %v233_v7, %v234_v8  ;;  %v237_v20 = vsel %vm217_vm2, %v234_v8, %v236_v9  ;;  %v63_v21 = vrot.slane %v25_v5, 7 }
  0x14   :  { %v2508_v23 = vpack.i.bf16 %v237_v20, %v235_v19  ;;  %v2883_v24 = vsel %vm47_vm0, %v60_v14, %v61_v16  ;;  %v2886_v25 = vsel %vm47_vm0, 0.0, %v60_v14  ;;  %v108_v26 = vsel %vm47_vm0, %v61_v16, 0.0 }
  0x15   :  { %2499 = vrot.lane.b32.xlu1 %v2498_v18, %s2751_s30  ;;  %v149_v27 = vrot.slane %v2886_v25, 1  ;;  %v150_v28 = vrot.slane %v2883_v24, 1  ;;  %v152_v29 = vrot.slane %v108_v26, 1  ;;  %v64_v30 = vrot.slane %v26_v17, 7 }
  0x16   :  { %2504 = vrot.lane.b32.xlu0 %v2503_v6, %s2752_s4  ;;  %v2894_v31 = vsel %vm47_vm0, 0.0, %v63_v21  ;;  %v238_v32 = vrot.slane %v2886_v25, 2  ;;  %v239_v33 = vrot.slane %v2883_v24, 2  ;;  %v241_v35 = vrot.slane %v108_v26, 2 }
  0x17   :  { %v151_v36 = vsel %vm128_vm1, %v149_v27, %v150_v28  ;;  %v153_v37 = vsel %vm128_vm1, %v150_v28, %v152_v29  ;;  %v2901_v38 = vsel %vm47_vm0, %v63_v21, %v64_v30  ;;  %v109_v39 = vsel %vm47_vm0, %v64_v30, 0.0 }
  0x18   :  { %v2513_v40 = vpack.i.bf16 %v153_v37, %v151_v36  ;;  %v154_v43 = vrot.slane %v2894_v31, 1  ;;  %v155_v44 = vrot.slane %v2901_v38, 1  ;;  %v157_v45 = vrot.slane %v109_v39, 1 }
  0x19   :  { %2509 = vrot.lane.b32.xlu1 %v2508_v23, %s2752_s4  ;;  %v240_v48 = vsel %vm217_vm2, %v238_v32, %v239_v33  ;;  %v242_v49 = vsel %vm217_vm2, %v239_v33, %v241_v35  ;;  %v243_v50 = vrot.slane %v2894_v31, 2  ;;  %v244_v51 = vrot.slane %v2901_v38, 2 }
  0x1a   :  { %2514 = vrot.lane.b32.xlu0 %v2513_v40, %s2751_s30  ;;  %v156_v54 = vsel %vm128_vm1, %v154_v43, %v155_v44  ;;  %v158_v55 = vsel %vm128_vm1, %v155_v44, %v157_v45  ;;  %v2523_v56 = vpack.i.bf16 %v242_v49, %v240_v48  ;;  %v246_v58 = vrot.slane %v109_v39, 2 }
  0x1b   :  { %v2518_v59 = vpack.i.bf16 %v158_v55, %v156_v54  ;;  %v245_v61 = vsel %vm217_vm2, %v243_v50, %v244_v51  ;;  %v66_v62 = vrot.slane %v27_v46, 7  ;;  %v67_v63 = vrot.slane %v28_v47, 7 }
  0x1c   :  { %v247_v0 = vsel %vm217_vm2, %v244_v51, %v246_v58  ;;  %v69_v1 = vrot.slane %v29_v52, 7  ;;  %v70_v2 = vrot.slane %v30_v53, 7  ;;  %v386_v39 = vsel %vm217_vm2, %v2825_v34, 0 }
  0x1d   :  { %2519 = vrot.lane.b32.xlu1 %v2518_v59, %s2751_s30  ;;  %v2528_v3 = vpack.i.bf16 %v247_v0, %v245_v61  ;;  %v2930_v4 = vsel %vm47_vm0, %v66_v62, %v67_v63  ;;  %v2933_v5 = vsel %vm47_vm0, 0.0, %v66_v62  ;;  %v110_v6 = vsel %vm47_vm0, %v67_v63, 0.0  ;;  %2392 = vmatpush3.bf16.msra.mxu0 %v386_v39 }
  0x1e   :  { %2524 = vrot.lane.b32.xlu0 %v2523_v56, %s2752_s4  ;;  %v159_v7 = vrot.slane %v2933_v5, 1  ;;  %v160_v8 = vrot.slane %v2930_v4, 1  ;;  %v162_v9 = vrot.slane %v110_v6, 1  ;;  %v2940_v10 = vsel %vm47_vm0, %v69_v1, %v70_v2 }
  0x1f   :  { %v2943_v11 = vsel %vm47_vm0, 0.0, %v69_v1  ;;  %v111_v14 = vsel %vm47_vm0, %v70_v2, 0.0  ;;  %v165_v16 = vrot.slane %v2940_v10, 1  ;;  %v248_v17 = vrot.slane %v2933_v5, 2 }
  0x20   :  { %v161_v18 = vsel %vm128_vm1, %v159_v7, %v160_v8  ;;  %v163_v19 = vsel %vm128_vm1, %v160_v8, %v162_v9  ;;  %v164_v20 = vrot.slane %v2943_v11, 1  ;;  %v167_v21 = vrot.slane %v111_v14, 1 }
  0x21   :  { %2529 = vrot.lane.b32.xlu1 %v2528_v3, %s2752_s4  ;;  %v2533_v23 = vpack.i.bf16 %v163_v19, %v161_v18  ;;  %v249_v26 = vrot.slane %v2930_v4, 2  ;;  %v251_v27 = vrot.slane %v110_v6, 2  ;;  %v253_v28 = vrot.slane %v2943_v11, 2 }
  0x22   :  { %v166_v29 = vsel %vm128_vm1, %v164_v20, %v165_v16  ;;  %v168_v30 = vsel %vm128_vm1, %v165_v16, %v167_v21  ;;  %v254_v32 = vrot.slane %v2940_v10, 2  ;;  %v256_v33 = vrot.slane %v111_v14, 2 }
  0x23   :  { %2534 = vrot.lane.b32.xlu0 %v2533_v23, %s2751_s30  ;;  %v2538_v35 = vpack.i.bf16 %v168_v30, %v166_v29  ;;  %v250_v36 = vsel %vm217_vm2, %v248_v17, %v249_v26  ;;  %v252_v37 = vsel %vm217_vm2, %v249_v26, %v251_v27  ;;  %vm857_vm6 = vcmask 1043456  }
  0x24   :  { %v2543_v40 = vpack.i.bf16 %v252_v37, %v250_v36  ;;  %v255_v43 = vsel %vm217_vm2, %v253_v28, %v254_v32  ;;  %v257_v44 = vsel %vm217_vm2, %v254_v32, %v256_v33  ;;  %vm789_vm7 = vcmask 130048  }
  0x25   :  { %2539 = vrot.lane.b32.xlu1 %v2538_v35, %s2751_s30  ;;  %v2548_v45 = vpack.i.bf16 %v257_v44, %v255_v43  ;;  %vm832_vm8 = vcmask 195584  }
  0x27   :  { %2544 = vrot.lane.b32.xlu0 %v2543_v40, %s2752_s4 }
  0x29   :  { %2549 = vrot.lane.b32.xlu1 %v2548_v45, %s2752_s4 }
  0x7c   :  { %v2475_v46 = vpop.permute.xlu0 %2474 }
  0x7d   :  { %v2477_v47 = vunpack.i.h.bf16 %v2475_v46  ;;  %v2476_v48 = vunpack.i.l.bf16 %v2475_v46  ;;  %v2485_v49 = vpop.permute.xlu1 %2484 }
  0x7e   :  { %v2487_v34 = vunpack.i.h.bf16 %v2485_v49  ;;  %v2486_v50 = vunpack.i.l.bf16 %v2485_v49 }
  0x7f   :  { %v307_v51 = vsel %vm306_vm3, %v2796_v13, %v2476_v48  ;;  %v308_v52 = vsel %vm306_vm3, %v2793_v12, %v2477_v47 }
  0x80   :  { %v2480_v53 = vpop.permute.xlu0 %2479  ;;  %v324_v54 = vsel %vm323_vm4, %v307_v51, %v2486_v50  ;;  %v325_v55 = vsel %vm323_vm4, %v308_v52, %v2487_v34 }
  0x81   :  { %v2482_v56 = vunpack.i.h.bf16 %v2480_v53  ;;  %v2481_v58 = vunpack.i.l.bf16 %v2480_v53  ;;  %v2490_v59 = vpop.permute.xlu1 %2489  ;;  %v340_v61 = vpack.c.bf16 %v325_v55, %v324_v54 }
  0x82   :  { %v2492_v62 = vunpack.i.h.bf16 %v2490_v59  ;;  %v2491_v63 = vunpack.i.l.bf16 %v2490_v59 }
  0x83   :  { %v310_v0 = vsel %vm306_vm3, %v2807_v22, %v2482_v56  ;;  %v309_v13 = vsel %vm306_vm3, %v2800_v15, %v2481_v58  ;;  %2393 = vmatprep.mubr.msk.bf16.mxu0 %vm360_vm5, %v340_v61 }
  0x84   :  { %v326_v12 = vsel %vm323_vm4, %v309_v13, %v2491_v63  ;;  %v327_v1 = vsel %vm323_vm4, %v310_v0, %v2492_v62  ;;  %v2495_v2 = vpop.permute.xlu0 %2494 }
  0x85   :  { %v2497_v3 = vunpack.i.h.bf16 %v2495_v2  ;;  %v2496_v6 = vunpack.i.l.bf16 %v2495_v2  ;;  %v341_v7 = vpack.c.bf16 %v327_v1, %v326_v12 }
  0x87   :  { %v2500_v8 = vpop.permute.xlu1 %2499  ;;  %2394 = vmatmul.mubr.msk.bf16.vlgmr.msra.gmra.mxu0 %vm360_vm5, %v341_v7  ;;  %v312_v9 = vsel %vm306_vm3, %v2833_v41, %v2497_v3  ;;  %v311_v22 = vsel %vm306_vm3, %v2836_v42, %v2496_v6 }
  0x88   :  { %v2502_v15 = vunpack.i.h.bf16 %v2500_v8  ;;  %v2501_v14 = vunpack.i.l.bf16 %v2500_v8  ;;  %v2505_v16 = vpop.permute.xlu0 %2504 }
  0x89   :  { %v2507_v17 = vunpack.i.h.bf16 %v2505_v16  ;;  %v2506_v18 = vunpack.i.l.bf16 %v2505_v16 }
  0x8a   :  { %v314_v19 = vsel %vm306_vm3, %v2856_v60, %v2502_v15  ;;  %v313_v20 = vsel %vm306_vm3, %v2852_v57, %v2501_v14 }
  0x8b   :  { %v328_v21 = vsel %vm323_vm4, %v311_v22, %v2506_v18  ;;  %v329_v23 = vsel %vm323_vm4, %v312_v9, %v2507_v17  ;;  %v2510_v26 = vpop.permute.xlu1 %2509 }
  0x8c   :  { %v2512_v41 = vunpack.i.h.bf16 %v2510_v26  ;;  %v2511_v27 = vunpack.i.l.bf16 %v2510_v26  ;;  %v2515_v28 = vpop.permute.xlu0 %2514  ;;  %v342_v42 = vpack.c.bf16 %v329_v23, %v328_v21 }
  0x8d   :  { %v2517_v29 = vunpack.i.h.bf16 %v2515_v28  ;;  %v2516_v30 = vunpack.i.l.bf16 %v2515_v28 }
  0x8e   :  { %v330_v32 = vsel %vm323_vm4, %v313_v20, %v2511_v27  ;;  %v331_v33 = vsel %vm323_vm4, %v314_v19, %v2512_v41  ;;  %2397 = vmatprep.mubr.msk.bf16.mxu0 %vm360_vm5, %v342_v42 }
  0x8f   :  { %v2520_v60 = vpop.permute.xlu1 %2519  ;;  %v343_v35 = vpack.c.bf16 %v331_v33, %v330_v32  ;;  %v316_v57 = vsel %vm306_vm3, %v2883_v24, %v2517_v29  ;;  %v315_v36 = vsel %vm306_vm3, %v2886_v25, %v2516_v30 }
  0x90   :  { %v2522_v37 = vunpack.i.h.bf16 %v2520_v60  ;;  %v2521_v39 = vunpack.i.l.bf16 %v2520_v60  ;;  %v2525_v40 = vpop.permute.xlu0 %2524 }
  0x91   :  { %2398 = vmatmul.mubr.msk.bf16.gmra.mxu0 %vm360_vm5, %v343_v35  ;;  %v2527_v43 = vunpack.i.h.bf16 %v2525_v40  ;;  %v2526_v44 = vunpack.i.l.bf16 %v2525_v40 }
  0x92   :  { %v318_v45 = vsel %vm306_vm3, %v2901_v38, %v2522_v37  ;;  %v317_v46 = vsel %vm306_vm3, %v2894_v31, %v2521_v39 }
  0x93   :  { %v332_v47 = vsel %vm323_vm4, %v315_v36, %v2526_v44  ;;  %v333_v24 = vsel %vm323_vm4, %v316_v57, %v2527_v43  ;;  %v2530_v48 = vpop.permute.xlu1 %2529 }
  0x94   :  { %v2532_v49 = vunpack.i.h.bf16 %v2530_v48  ;;  %v2531_v25 = vunpack.i.l.bf16 %v2530_v48  ;;  %v344_v34 = vpack.c.bf16 %v333_v24, %v332_v47 }
  0x95   :  { %v2535_v50 = vpop.permute.xlu0 %2534 }
  0x96   :  { %v334_v51 = vsel %vm323_vm4, %v317_v46, %v2531_v25  ;;  %v335_v52 = vsel %vm323_vm4, %v318_v45, %v2532_v49  ;;  %v2537_v53 = vunpack.i.h.bf16 %v2535_v50  ;;  %v2536_v54 = vunpack.i.l.bf16 %v2535_v50  ;;  %2401 = vmatprep.mubr.msk.bf16.mxu0 %vm360_vm5, %v344_v34 }
  0x97   :  { %v2540_v38 = vpop.permute.xlu1 %2539  ;;  %v345_v55 = vpack.c.bf16 %v335_v52, %v334_v51 }
  0x98   :  { %v2542_v31 = vunpack.i.h.bf16 %v2540_v38  ;;  %v2541_v56 = vunpack.i.l.bf16 %v2540_v38  ;;  %v320_v58 = vsel %vm306_vm3, %v2930_v4, %v2537_v53  ;;  %v319_v59 = vsel %vm306_vm3, %v2933_v5, %v2536_v54 }
  0x99   :  { %2402 = vmatmul.mubr.msk.bf16.gmra.mxu0 %vm360_vm5, %v345_v55  ;;  %v2545_v61 = vpop.permute.xlu0 %2544 }
  0x9a   :  { %v2547_v62 = vunpack.i.h.bf16 %v2545_v61  ;;  %v2546_v63 = vunpack.i.l.bf16 %v2545_v61  ;;  %v322_v0 = vsel %vm306_vm3, %v2940_v10, %v2542_v31  ;;  %v321_v13 = vsel %vm306_vm3, %v2943_v11, %v2541_v56  ;;  %v3026_v10 = vld [vmem:[%s4063_s2] ss:$0 sm:$0xff] }
  0x9b   :  { %v2550_v12 = vpop.permute.xlu1 %2549 }
  0x9c   :  { %v336_v1 = vsel %vm323_vm4, %v319_v59, %v2546_v63  ;;  %v337_v2 = vsel %vm323_vm4, %v320_v58, %v2547_v62  ;;  %v2552_v4 = vunpack.i.h.bf16 %v2550_v12  ;;  %v2551_v3 = vunpack.i.l.bf16 %v2550_v12 }
  0x9d   :  { %v346_v6 = vpack.c.bf16 %v337_v2, %v336_v1 }
  0x9e   :  { %v338_v5 = vsel %vm323_vm4, %v321_v13, %v2551_v3  ;;  %v339_v7 = vsel %vm323_vm4, %v322_v0, %v2552_v4 }
  0x9f   :  { %v347_v8 = vpack.c.bf16 %v339_v7, %v338_v5  ;;  %2405 = vmatprep.mubr.msk.bf16.mxu0 %vm360_vm5, %v346_v6 }
  0xa1   :  { %2406 = vmatmul.mubr.msk.bf16.gmra.mxu0 %vm360_vm5, %v347_v8 }
 0x147   :  { %v2395_v11 = vpop.f32.mrf.mxu0 }
 0x148   :  { %v431_v9 = vadd.f32 %v2395_v11, %v3026_v10 }
 0x149   :  { %v422_v22 = vpop.f32.mrf.mxu0 }
 0x14a   :  { %v487_v15 = vmax.f32 %v431_v9, 0.0  ;;  %v423_v14 = vadd.f32 %v3026_v10, %v422_v22 }
 0x14b   :  { %v2396_v16 = vpop.f32.mrf.mxu0 }
 0x14c   :  { %v520_v17 = vrot.slane %v487_v15, 7  ;;  %v485_v18 = vmax.f32 %v423_v14, 0.0  ;;  %v434_v19 = vadd.f32 %v2396_v16, %v3026_v10 }
 0x14d   :  { %v425_v20 = vpop.f32.mrf.mxu0 }
 0x14e   :  { %v3032_v21 = vsel %vm47_vm0, 0.0, %v520_v17  ;;  %v517_v23 = vrot.slane %v485_v18, 7  ;;  %v488_v26 = vmax.f32 %v434_v19, 0.0  ;;  %v426_v41 = vadd.f32 %v3026_v10, %v425_v20 }
 0x14f   :  { %v602_v29 = vrot.slane %v3032_v21, 1  ;;  %v690_v30 = vrot.slane %v3032_v21, 2 }
 0x150   :  { %v3036_v27 = vsel %vm47_vm0, 0.0, %v517_v23  ;;  %v521_v28 = vrot.slane %v488_v26, 7  ;;  %v486_v42 = vmax.f32 %v426_v41, 0.0 }
 0x151   :  { %v597_v32 = vrot.slane %v3036_v27, 1  ;;  %v2399_v33 = vpop.f32.mrf.mxu0  ;;  %v685_v37 = vrot.slane %v3036_v27, 2 }
 0x152   :  { %v3042_v60 = vsel %vm47_vm0, %v520_v17, %v521_v28  ;;  %v574_v35 = vsel %vm47_vm0, %v521_v28, 0.0  ;;  %v518_v57 = vrot.slane %v486_v42, 7  ;;  %v447_v36 = vadd.f32 %v2399_v33, %v3026_v10 }
 0x153   :  { %v603_v39 = vrot.slane %v3042_v60, 1  ;;  %v605_v40 = vrot.slane %v574_v35, 1  ;;  %v691_v43 = vrot.slane %v3042_v60, 2  ;;  %v438_v44 = vpop.f32.mrf.mxu0  ;;  %v693_v48 = vrot.slane %v574_v35, 2 }
 0x154   :  { %v3050_v45 = vsel %vm47_vm0, %v517_v23, %v518_v57  ;;  %v3053_v46 = vsel %vm47_vm0, %v518_v57, 0.0  ;;  %v491_v47 = vmax.f32 %v447_v36, 0.0  ;;  %v439_v24 = vadd.f32 %v3026_v10, %v438_v44 }
 0x155   :  { %v598_v49 = vrot.slane %v3050_v45, 1  ;;  %v600_v25 = vrot.slane %v3053_v46, 1  ;;  %v686_v34 = vrot.slane %v3050_v45, 2  ;;  %v2400_v50 = vpop.f32.mrf.mxu0  ;;  %v604_v54 = vsel %vm128_vm1, %v602_v29, %v603_v39 }
 0x156   :  { %v526_v51 = vrot.slane %v491_v47, 7  ;;  %v489_v52 = vmax.f32 %v439_v24, 0.0  ;;  %v450_v53 = vadd.f32 %v2400_v50, %v3026_v10  ;;  %v688_v38 = vrot.slane %v3053_v46, 2 }
 0x157   :  { %v441_v55 = vpop.f32.mrf.mxu0  ;;  %v606_v31 = vsel %vm128_vm1, %v603_v39, %v605_v40  ;;  %v599_v56 = vsel %vm128_vm1, %v597_v32, %v598_v49  ;;  %v601_v58 = vsel %vm128_vm1, %v598_v49, %v600_v25  ;;  %v692_v2 = vsel %vm217_vm2, %v690_v30, %v691_v43 }
 0x158   :  { %v3066_v59 = vsel %vm47_vm0, 0.0, %v526_v51  ;;  %v523_v61 = vrot.slane %v489_v52, 7  ;;  %v492_v62 = vmax.f32 %v450_v53, 0.0  ;;  %v442_v63 = vadd.f32 %v3026_v10, %v441_v55 }
 0x159   :  { %v612_v0 = vrot.slane %v3066_v59, 1  ;;  %v2403_v13 = vpop.f32.mrf.mxu0  ;;  %v2553_v12 = vpack.i.bf16 %v606_v31, %v604_v54  ;;  %v2563_v1 = vpack.i.bf16 %v601_v58, %v599_v56  ;;  %v700_v7 = vrot.slane %v3066_v59, 2 }
 0x15a   :  { %v3072_v4 = vsel %vm47_vm0, 0.0, %v523_v61  ;;  %v527_v3 = vrot.slane %v492_v62, 7  ;;  %v490_v6 = vmax.f32 %v442_v63, 0.0  ;;  %v463_v5 = vadd.f32 %v2403_v13, %v3026_v10 }
 0x15b   :  { %v607_v8 = vrot.slane %v3072_v4, 1  ;;  %v695_v11 = vrot.slane %v3072_v4, 2  ;;  %2554 = vrot.lane.b32.xlu1 %v2553_v12, %s2752_s4  ;;  %v454_v9 = vpop.f32.mrf.mxu0  ;;  %2564 = vrot.lane.b32.xlu0 %v2563_v1, %s2752_s4  ;;  %v694_v22 = vsel %vm217_vm2, %v691_v43, %v693_v48  ;;  %v687_v26 = vsel %vm217_vm2, %v685_v37, %v686_v34 }
 0x15c   :  { %v3082_v15 = vsel %vm47_vm0, %v526_v51, %v527_v3  ;;  %v3085_v14 = vsel %vm47_vm0, %v527_v3, 0.0  ;;  %v524_v16 = vrot.slane %v490_v6, 7  ;;  %v495_v17 = vmax.f32 %v463_v5, 0.0 }
 0x15d   :  { %v613_v18 = vrot.slane %v3082_v15, 1  ;;  %v615_v19 = vrot.slane %v3085_v14, 1  ;;  %v701_v20 = vrot.slane %v3082_v15, 2  ;;  %v2404_v23 = vpop.f32.mrf.mxu0  ;;  %v455_v29 = vadd.f32 %v3026_v10, %v454_v9 }
 0x15e   :  { %v3092_v41 = vsel %vm47_vm0, %v523_v61, %v524_v16  ;;  %v3095_v28 = vsel %vm47_vm0, %v524_v16, 0.0  ;;  %v532_v42 = vrot.slane %v495_v17, 7  ;;  %v703_v30 = vrot.slane %v3085_v14, 2 }
 0x15f   :  { %v608_v32 = vrot.slane %v3092_v41, 1  ;;  %v610_v33 = vrot.slane %v3095_v28, 1  ;;  %v696_v35 = vrot.slane %v3092_v41, 2  ;;  %v457_v57 = vpop.f32.mrf.mxu0  ;;  %v493_v37 = vmax.f32 %v455_v29, 0.0 }
 0x160   :  { %v3103_v36 = vsel %vm47_vm0, 0.0, %v532_v42  ;;  %v466_v39 = vadd.f32 %v2404_v23, %v3026_v10  ;;  %v2558_v40 = vpack.i.bf16 %v694_v22, %v692_v2  ;;  %v698_v43 = vrot.slane %v3095_v28, 2 }
 0x161   :  { %v622_v44 = vrot.slane %v3103_v36, 1  ;;  %v458_v46 = vadd.f32 %v3026_v10, %v457_v57  ;;  %v689_v47 = vsel %vm217_vm2, %v686_v34, %v688_v38  ;;  %v2407_v24 = vpop.f32.mrf.mxu0  ;;  %v529_v48 = vrot.slane %v493_v37, 7 }
 0x162   :  { %v496_v49 = vmax.f32 %v466_v39, 0.0  ;;  %2559 = vrot.lane.b32.xlu1 %v2558_v40, %s2753_s22  ;;  %v2568_v25 = vpack.i.bf16 %v689_v47, %v687_v26  ;;  %v479_v50 = vadd.f32 %v2407_v24, %v3026_v10  ;;  %v710_v51 = vrot.slane %v3103_v36, 2 }
 0x163   :  { %v494_v52 = vmax.f32 %v458_v46, 0.0  ;;  %v614_v53 = vsel %vm128_vm1, %v612_v0, %v613_v18  ;;  %v616_v54 = vsel %vm128_vm1, %v613_v18, %v615_v19  ;;  %v470_v55 = vpop.f32.mrf.mxu0  ;;  %v3116_v31 = vsel %vm47_vm0, 0.0, %v529_v48 }
 0x164   :  { %v533_v34 = vrot.slane %v496_v49, 7  ;;  %2569 = vrot.lane.b32.xlu0 %v2568_v25, %s2753_s22  ;;  %v499_v38 = vmax.f32 %v479_v50, 0.0  ;;  %v2573_v56 = vpack.i.bf16 %v616_v54, %v614_v53  ;;  %v617_v58 = vrot.slane %v3116_v31, 1 }
 0x165   :  { %v530_v61 = vrot.slane %v494_v52, 7  ;;  %v471_v62 = vadd.f32 %v3026_v10, %v470_v55  ;;  %v609_v63 = vsel %vm128_vm1, %v607_v8, %v608_v32  ;;  %v2408_v13 = vpop.f32.mrf.mxu0  ;;  %v705_v0 = vrot.slane %v3116_v31, 2 }
 0x166   :  { %v3124_v12 = vsel %vm47_vm0, %v532_v42, %v533_v34  ;;  %v578_v1 = vsel %vm47_vm0, %v533_v34, 0.0  ;;  %v538_v2 = vrot.slane %v499_v38, 7  ;;  %2574 = vrot.lane.b32.xlu1 %v2573_v56, %s2752_s4  ;;  %v611_v9 = vsel %vm128_vm1, %v608_v32, %v610_v33 }
 0x167   :  { %v623_v3 = vrot.slane %v3124_v12, 1  ;;  %v625_v6 = vrot.slane %v578_v1, 1  ;;  %v711_v5 = vrot.slane %v3124_v12, 2  ;;  %v3132_v8 = vsel %vm47_vm0, %v529_v48, %v530_v61  ;;  %v473_v17 = vpop.f32.mrf.mxu0 }
 0x168   :  { %v577_v22 = vsel %vm47_vm0, %v530_v61, 0.0  ;;  %v3136_v14 = vsel %vm47_vm0, 0.0, %v538_v2  ;;  %v497_v16 = vmax.f32 %v471_v62, 0.0  ;;  %v713_v18 = vrot.slane %v578_v1, 2 }
 0x169   :  { %v618_v19 = vrot.slane %v3132_v8, 1  ;;  %v620_v23 = vrot.slane %v577_v22, 1  ;;  %v706_v26 = vrot.slane %v3132_v8, 2  ;;  %v708_v28 = vrot.slane %v577_v22, 2 }
 0x16a   :  { %v632_v42 = vrot.slane %v3136_v14, 1  ;;  %v535_v29 = vrot.slane %v497_v16, 7  ;;  %v2583_v32 = vpack.i.bf16 %v611_v9, %v609_v63  ;;  %v482_v33 = vadd.f32 %v2408_v13, %v3026_v10  ;;  %v2714_v16 = vld [vmem:[%s4062_s1 + $0x14] ss:$0 sps:$4 sm:$0xff]  }
 0x16b   :  { %v702_v57 = vsel %vm217_vm2, %v700_v7, %v701_v20  ;;  %v704_v37 = vsel %vm217_vm2, %v701_v20, %v703_v30  ;;  %v474_v39 = vadd.f32 %v3026_v10, %v473_v17  ;;  %v697_v47 = vsel %vm217_vm2, %v695_v11, %v696_v35  ;;  %2468 = vmatprep.subr.msk.bf16.mxu1 %vm857_vm6, %v2714_v16 }
 0x16c   :  { %v3152_v40 = vsel %vm47_vm0, 0.0, %v535_v29  ;;  %2584 = vrot.lane.b32.xlu0 %v2583_v32, %s2752_s4  ;;  %v2578_v46 = vpack.i.bf16 %v704_v37, %v702_v57  ;;  %v699_v7 = vsel %vm217_vm2, %v696_v35, %v698_v43  ;;  %v720_v20 = vrot.slane %v3136_v14, 2 }
 0x16d   :  { %v627_v10 = vrot.slane %v3152_v40, 1  ;;  %v500_v30 = vmax.f32 %v482_v33, 0.0  ;;  %v498_v24 = vmax.f32 %v474_v39, 0.0  ;;  %v2588_v48 = vpack.i.bf16 %v699_v7, %v697_v47 }
 0x16e   :  { %2579 = vrot.lane.b32.xlu1 %v2578_v46, %s2753_s22  ;;  %v624_v49 = vsel %vm128_vm1, %v622_v44, %v623_v3  ;;  %v626_v25 = vsel %vm128_vm1, %v623_v3, %v625_v6  ;;  %v619_v11 = vsel %vm128_vm1, %v617_v58, %v618_v19  ;;  %v621_v43 = vsel %vm128_vm1, %v618_v19, %v620_v23 }
 0x16f   :  { %v539_v50 = vrot.slane %v500_v30, 7  ;;  %v536_v52 = vrot.slane %v498_v24, 7  ;;  %v2593_v35 = vpack.i.bf16 %v626_v25, %v624_v49  ;;  %v715_v53 = vrot.slane %v3152_v40, 2 }
 0x170   :  { %2589 = vrot.lane.b32.xlu0 %v2588_v48, %s2753_s22  ;;  %v2603_v54 = vpack.i.bf16 %v621_v43, %v619_v11  ;;  %v712_v55 = vsel %vm217_vm2, %v710_v51, %v711_v5  ;;  %v714_v44 = vsel %vm217_vm2, %v711_v5, %v713_v18  ;;  %v707_v51 = vsel %vm217_vm2, %v705_v0, %v706_v26 }
 0x171   :  { %v3179_v34 = vsel %vm47_vm0, %v538_v2, %v539_v50  ;;  %v580_v38 = vsel %vm47_vm0, %v539_v50, 0.0  ;;  %v3183_v56 = vsel %vm47_vm0, %v535_v29, %v536_v52  ;;  %v579_v58 = vsel %vm47_vm0, %v536_v52, 0.0 }
 0x172   :  { %v633_v61 = vrot.slane %v3179_v34, 1  ;;  %v635_v62 = vrot.slane %v580_v38, 1  ;;  %v721_v63 = vrot.slane %v3179_v34, 2  ;;  %2594 = vrot.lane.b32.xlu1 %v2593_v35, %s2752_s4  ;;  %v723_v13 = vrot.slane %v580_v38, 2 }
 0x173   :  { %v628_v1 = vrot.slane %v3183_v56, 1  ;;  %v630_v2 = vrot.slane %v579_v58, 1  ;;  %v716_v3 = vrot.slane %v3183_v56, 2  ;;  %v2598_v6 = vpack.i.bf16 %v714_v44, %v712_v55 }
 0x174   :  { %2604 = vrot.lane.b32.xlu0 %v2603_v54, %s2752_s4  ;;  %v709_v5 = vsel %vm217_vm2, %v706_v26, %v708_v28  ;;  %v634_v9 = vsel %vm128_vm1, %v632_v42, %v633_v61  ;;  %v636_v22 = vsel %vm128_vm1, %v633_v61, %v635_v62  ;;  %v718_v0 = vrot.slane %v579_v58, 2  ;;  %v2715_v26 = vld [vmem:[%s4062_s1 + $0xc] sm:$0xff]  }
 0x175   :  { %v2608_v17 = vpack.i.bf16 %v709_v5, %v707_v51  ;;  %v629_v18 = vsel %vm128_vm1, %v627_v10, %v628_v1  ;;  %v631_v19 = vsel %vm128_vm1, %v628_v1, %v630_v2  ;;  %v2613_v23 = vpack.i.bf16 %v636_v22, %v634_v9 }
 0x176   :  { %2599 = vrot.lane.b32.xlu1 %v2598_v6, %s2753_s22  ;;  %v722_v28 = vsel %vm217_vm2, %v720_v20, %v721_v63  ;;  %v724_v42 = vsel %vm217_vm2, %v721_v63, %v723_v13  ;;  %v2618_v29 = vpack.i.bf16 %v631_v19, %v629_v18  ;;  %v859_v32 = vsel %vm857_vm6, %v2714_v16, 0 }
 0x177   :  { %v717_v33 = vsel %vm217_vm2, %v715_v53, %v716_v3  ;;  %v719_v57 = vsel %vm217_vm2, %v716_v3, %v718_v0  ;;  %2410 = vmatpush3.bf16.msra.mxu1 %v859_v32  ;;  %v2628_v37 = vpack.i.bf16 %v724_v42, %v722_v28 }
 0x178   :  { %2609 = vrot.lane.b32.xlu0 %v2608_v17, %s2753_s22  ;;  %2411 = vmatprep.subr.bf16.mxu1 %v2715_v26  ;;  %v2623_v39 = vpack.i.bf16 %v719_v57, %v717_v33 }
 0x17a   :  { %2614 = vrot.lane.b32.xlu1 %v2613_v23, %s2752_s4 }
 0x17b   :  { %2412 = vmatpush3.bf16.msra.mxu1 %v2715_v26 }
 0x17c   :  { %2619 = vrot.lane.b32.xlu0 %v2618_v29, %s2752_s4 }
 0x17e   :  { %2629 = vrot.lane.b32.xlu1 %v2628_v37, %s2753_s22 }
 0x180   :  { %2624 = vrot.lane.b32.xlu0 %v2623_v39, %s2753_s22 }
 0x1cd   :  { %v2555_v46 = vpop.permute.xlu1 %2554  ;;  %v2565_v47 = vpop.permute.xlu0 %2564 }
 0x1ce   :  { %v2557_v7 = vunpack.i.h.bf16 %v2555_v46  ;;  %v2556_v20 = vunpack.i.l.bf16 %v2555_v46  ;;  %v2567_v10 = vunpack.i.h.bf16 %v2565_v47  ;;  %v2566_v30 = vunpack.i.l.bf16 %v2565_v47 }
 0x1d0   :  { %v776_v11 = vsel %vm323_vm4, %v3042_v60, %v2557_v7  ;;  %v775_v50 = vsel %vm323_vm4, %v3032_v21, %v2556_v20  ;;  %v773_v54 = vsel %vm323_vm4, %v3036_v27, %v2566_v30  ;;  %v774_v55 = vsel %vm323_vm4, %v3050_v45, %v2567_v10 }
 0x1d4   :  { %v2560_v24 = vpop.permute.xlu1 %2559 }
 0x1d5   :  { %v2562_v48 = vunpack.i.h.bf16 %v2560_v24  ;;  %v2561_v49 = vunpack.i.l.bf16 %v2560_v24 }
 0x1d6   :  { %v2570_v25 = vpop.permute.xlu0 %2569 }
 0x1d7   :  { %v2572_v52 = vunpack.i.h.bf16 %v2570_v25  ;;  %v2571_v35 = vunpack.i.l.bf16 %v2570_v25  ;;  %v792_v43 = vsel %vm789_vm7, %v775_v50, %v2561_v49  ;;  %v793_v53 = vsel %vm789_vm7, %v776_v11, %v2562_v48 }
 0x1d8   :  { %v2575_v60 = vpop.permute.xlu1 %2574  ;;  %v807_v21 = vpack.c.bf16 %v793_v53, %v792_v43 }
 0x1d9   :  { %v790_v44 = vsel %vm789_vm7, %v773_v54, %v2571_v35  ;;  %v791_v38 = vsel %vm789_vm7, %v774_v55, %v2572_v52  ;;  %v2577_v62 = vunpack.i.h.bf16 %v2575_v60  ;;  %v2576_v63 = vunpack.i.l.bf16 %v2575_v60 }
 0x1da   :  { %v806_v58 = vpack.c.bf16 %v791_v38, %v790_v44 }
 0x1db   :  { %v780_v3 = vsel %vm323_vm4, %v3082_v15, %v2577_v62  ;;  %v779_v6 = vsel %vm323_vm4, %v3066_v59, %v2576_v63 }
 0x1dc   :  { %2413 = vmatprep.mubr.msk.bf16.mxu1 %vm832_vm8, %v806_v58 }
 0x1dd   :  { %2414 = vmatmul.mubr.msk.bf16.vlgmr.msra.gmra.mxu1 %vm832_vm8, %v807_v21 }
 0x1de   :  { %v2585_v61 = vpop.permute.xlu0 %2584 }
 0x1df   :  { %v2587_v51 = vunpack.i.h.bf16 %v2585_v61  ;;  %v2586_v27 = vunpack.i.l.bf16 %v2585_v61 }
 0x1e0   :  { %v2580_v13 = vpop.permute.xlu1 %2579 }
 0x1e1   :  { %v2582_v1 = vunpack.i.h.bf16 %v2580_v13  ;;  %v2581_v45 = vunpack.i.l.bf16 %v2580_v13  ;;  %v778_v22 = vsel %vm323_vm4, %v3092_v41, %v2587_v51  ;;  %v777_v16 = vsel %vm323_vm4, %v3072_v4, %v2586_v27 }
 0x1e2   :  { %v2590_v2 = vpop.permute.xlu0 %2589 }
 0x1e3   :  { %v2592_v5 = vunpack.i.h.bf16 %v2590_v2  ;;  %v2591_v9 = vunpack.i.l.bf16 %v2590_v2  ;;  %v796_v0 = vsel %vm789_vm7, %v779_v6, %v2581_v45  ;;  %v797_v17 = vsel %vm789_vm7, %v780_v3, %v2582_v1 }
 0x1e4   :  { %v2595_v18 = vpop.permute.xlu1 %2594  ;;  %v809_v59 = vpack.c.bf16 %v797_v17, %v796_v0 }
 0x1e5   :  { %v794_v19 = vsel %vm789_vm7, %v777_v16, %v2591_v9  ;;  %v795_v15 = vsel %vm789_vm7, %v778_v22, %v2592_v5  ;;  %v2597_v28 = vunpack.i.h.bf16 %v2595_v18  ;;  %v2596_v42 = vunpack.i.l.bf16 %v2595_v18 }
 0x1e6   :  { %v808_v23 = vpack.c.bf16 %v795_v15, %v794_v19  ;;  %v2605_v26 = vpop.permute.xlu0 %2604 }
 0x1e7   :  { %v2607_v29 = vunpack.i.h.bf16 %v2605_v26  ;;  %v2606_v32 = vunpack.i.l.bf16 %v2605_v26  ;;  %v784_v37 = vsel %vm323_vm4, %v3124_v12, %v2597_v28  ;;  %v783_v39 = vsel %vm323_vm4, %v3103_v36, %v2596_v42 }
 0x1e8   :  { %v2600_v41 = vpop.permute.xlu1 %2599  ;;  %2417 = vmatprep.mubr.msk.bf16.mxu1 %vm832_vm8, %v808_v23 }
 0x1e9   :  { %v2602_v4 = vunpack.i.h.bf16 %v2600_v41  ;;  %v2601_v33 = vunpack.i.l.bf16 %v2600_v41  ;;  %2418 = vmatmul.mubr.msk.bf16.gmra.mxu1 %vm832_vm8, %v809_v59  ;;  %v782_v7 = vsel %vm323_vm4, %v3132_v8, %v2607_v29  ;;  %v781_v20 = vsel %vm323_vm4, %v3116_v31, %v2606_v32 }
 0x1ea   :  { %v2610_v57 = vpop.permute.xlu0 %2609 }
 0x1eb   :  { %v2612_v46 = vunpack.i.h.bf16 %v2610_v57  ;;  %v2611_v47 = vunpack.i.l.bf16 %v2610_v57  ;;  %v800_v10 = vsel %vm789_vm7, %v783_v39, %v2601_v33  ;;  %v801_v30 = vsel %vm789_vm7, %v784_v37, %v2602_v4 }
 0x1ec   :  { %v2615_v24 = vpop.permute.xlu1 %2614  ;;  %v811_v36 = vpack.c.bf16 %v801_v30, %v800_v10 }
 0x1ed   :  { %v798_v48 = vsel %vm789_vm7, %v781_v20, %v2611_v47  ;;  %v799_v12 = vsel %vm789_vm7, %v782_v7, %v2612_v46  ;;  %v2617_v11 = vunpack.i.h.bf16 %v2615_v24  ;;  %v2616_v50 = vunpack.i.l.bf16 %v2615_v24 }
 0x1ee   :  { %v810_v49 = vpack.c.bf16 %v799_v12, %v798_v48  ;;  %v2620_v25 = vpop.permute.xlu0 %2619 }
 0x1ef   :  { %v2622_v52 = vunpack.i.h.bf16 %v2620_v25  ;;  %v2621_v35 = vunpack.i.l.bf16 %v2620_v25  ;;  %v788_v54 = vsel %vm323_vm4, %v3179_v34, %v2617_v11  ;;  %v787_v55 = vsel %vm323_vm4, %v3136_v14, %v2616_v50  ;;  %v3275_v14 = vld [vmem:[%s4063_s2 + $0x1] ss:$0 sm:$0xff] }
 0x1f0   :  { %v2630_v8 = vpop.permute.xlu1 %2629  ;;  %2421 = vmatprep.mubr.msk.bf16.mxu1 %vm832_vm8, %v810_v49 }
 0x1f1   :  { %v2632_v31 = vunpack.i.h.bf16 %v2630_v8  ;;  %v2631_v43 = vunpack.i.l.bf16 %v2630_v8  ;;  %2422 = vmatmul.mubr.msk.bf16.gmra.mxu1 %vm832_vm8, %v811_v36  ;;  %v786_v60 = vsel %vm323_vm4, %v3183_v56, %v2622_v52  ;;  %v785_v58 = vsel %vm323_vm4, %v3152_v40, %v2621_v35 }
 0x1f2   :  { %v2625_v53 = vpop.permute.xlu0 %2624 }
 0x1f3   :  { %v2627_v44 = vunpack.i.h.bf16 %v2625_v53  ;;  %v2626_v38 = vunpack.i.l.bf16 %v2625_v53  ;;  %v804_v21 = vsel %vm789_vm7, %v787_v55, %v2631_v43  ;;  %v805_v61 = vsel %vm789_vm7, %v788_v54, %v2632_v31 }
 0x1f4   :  { %v813_v51 = vpack.c.bf16 %v805_v61, %v804_v21 }
 0x1f5   :  { %v802_v62 = vsel %vm789_vm7, %v785_v58, %v2626_v38  ;;  %v803_v63 = vsel %vm789_vm7, %v786_v60, %v2627_v44 }
 0x1f6   :  { %v812_v34 = vpack.c.bf16 %v803_v63, %v802_v62 }
 0x1f8   :  { %2425 = vmatprep.mubr.msk.bf16.mxu1 %vm832_vm8, %v812_v34 }
 0x1f9   :  { %2426 = vmatmul.mubr.msk.bf16.gmra.mxu1 %vm832_vm8, %v813_v51 }
 0x29d   :  { %v2415_v40 = vpop.f32.mrf.mxu1 }
 0x29e   :  { %v3278_v56 = vadd.f32 %v2415_v40, %v3275_v14 }
 0x29f   :  { %v895_v27 = vpop.f32.mrf.mxu1 }
 0x2a0   :  { %v3281_v13 = vadd.f32 %v3275_v14, %v895_v27  ;;  %v964_v1 = vsel %vm323_vm4, %v3278_v56, 0.0  ;;  %v1064_v45 = vmul.f32 %v3278_v56, %v3278_v56 }
 0x2a1   :  { %965 = vadd.xlane.f32.xlu0 %v964_v1  ;;  %v2416_v2 = vpop.f32.mrf.mxu1 }
 0x2a2   :  { %v1084_v3 = vsel %vm323_vm4, %v1064_v45, 0.0  ;;  %v1062_v6 = vmul.f32 %v3281_v13, %v3281_v13  ;;  %v3291_v9 = vadd.f32 %v2416_v2, %v3275_v14  ;;  %v958_v22 = vsel %vm323_vm4, %v3281_v13, 0.0 }
 0x2a3   :  { %1085 = vadd.xlane.f32.xlu1 %v1084_v3  ;;  %v898_v5 = vpop.f32.mrf.mxu1 }
 0x2a4   :  { %v3296_v16 = vadd.f32 %v3275_v14, %v898_v5  ;;  %v1078_v0 = vsel %vm323_vm4, %v1062_v6, 0.0  ;;  %v967_v17 = vsel %vm323_vm4, %v3291_v9, 0.0  ;;  %v1065_v18 = vmul.f32 %v3291_v9, %v3291_v9 }
 0x2a5   :  { %959 = vadd.xlane.f32.xlu0 %v958_v22 }
 0x2a6   :  { %v961_v23 = vsel %vm323_vm4, %v3296_v16, 0.0  ;;  %v1087_v59 = vsel %vm323_vm4, %v1065_v18, 0.0  ;;  %v1063_v28 = vmul.f32 %v3296_v16, %v3296_v16 }
 0x2a7   :  { %1079 = vadd.xlane.f32.xlu1 %v1078_v0 }
 0x2a8   :  { %v1081_v4 = vsel %vm323_vm4, %v1063_v28, 0.0  ;;  %v2716_v28 = vld [vmem:[%s4062_s1 + $0x20] ss:$0 sps:$4 sm:$0xff]  }
 0x2a9   :  { %v2419_v19 = vpop.f32.mrf.mxu1  ;;  %968 = vadd.xlane.f32.xlu0 %v967_v17  ;;  %2469 = vmatprep.subr.msk.bf16.mxu0 %vm857_vm6, %v2716_v28 }
 0x2aa   :  { %v3304_v15 = vadd.f32 %v2419_v19, %v3275_v14 }
 0x2ab   :  { %v911_v26 = vpop.f32.mrf.mxu1  ;;  %962 = vadd.xlane.f32.xlu1 %v961_v23 }
 0x2ac   :  { %v3312_v29 = vadd.f32 %v3275_v14, %v911_v26  ;;  %v976_v32 = vsel %vm323_vm4, %v3304_v15, 0.0  ;;  %v1068_v37 = vmul.f32 %v3304_v15, %v3304_v15 }
 0x2ad   :  { %v2420_v42 = vpop.f32.mrf.mxu1  ;;  %1088 = vadd.xlane.f32.xlu0 %v1087_v59 }
 0x2ae   :  { %v3317_v41 = vadd.f32 %v2420_v42, %v3275_v14  ;;  %v970_v57 = vsel %vm323_vm4, %v3312_v29, 0.0  ;;  %v1096_v7 = vsel %vm323_vm4, %v1068_v37, 0.0  ;;  %v1066_v20 = vmul.f32 %v3312_v29, %v3312_v29 }
 0x2af   :  { %977 = vadd.xlane.f32.xlu1 %v976_v32  ;;  %v914_v33 = vpop.f32.mrf.mxu1  ;;  %v1675_v32 = vsel %vm857_vm6, %v2716_v28, 0 }
 0x2b0   :  { %v3325_v39 = vadd.f32 %v3275_v14, %v914_v33  ;;  %v979_v46 = vsel %vm323_vm4, %v3317_v41, 0.0  ;;  %v1069_v30 = vmul.f32 %v3317_v41, %v3317_v41  ;;  %v1090_v12 = vsel %vm323_vm4, %v1066_v20, 0.0  ;;  %2430 = vmatpush3.bf16.msra.mxu0 %v1675_v32 }
 0x2b1   :  { %1082 = vadd.xlane.f32.xlu0 %v1081_v4  ;;  %v2423_v47 = vpop.f32.mrf.mxu1 }
 0x2b2   :  { %v973_v10 = vsel %vm323_vm4, %v3325_v39, 0.0  ;;  %v3337_v48 = vadd.f32 %v2423_v47, %v3275_v14  ;;  %v1099_v49 = vsel %vm323_vm4, %v1069_v30, 0.0  ;;  %v1067_v25 = vmul.f32 %v3325_v39, %v3325_v39 }
 0x2b3   :  { %971 = vadd.xlane.f32.xlu1 %v970_v57  ;;  %v927_v24 = vpop.f32.mrf.mxu1 }
 0x2b4   :  { %v3344_v11 = vadd.f32 %v3275_v14, %v927_v24  ;;  %v988_v50 = vsel %vm323_vm4, %v3337_v48, 0.0  ;;  %v1093_v35 = vsel %vm323_vm4, %v1067_v25, 0.0  ;;  %v1072_v43 = vmul.f32 %v3337_v48, %v3337_v48 }
 0x2b5   :  { %980 = vadd.xlane.f32.xlu0 %v979_v46  ;;  %v2424_v36 = vpop.f32.mrf.mxu1 }
 0x2b6   :  { %v3349_v52 = vadd.f32 %v2424_v36, %v3275_v14  ;;  %v982_v31 = vsel %vm323_vm4, %v3344_v11, 0.0  ;;  %v1108_v44 = vsel %vm323_vm4, %v1072_v43, 0.0  ;;  %v1070_v38 = vmul.f32 %v3344_v11, %v3344_v11 }
 0x2b7   :  { %1097 = vadd.xlane.f32.xlu1 %v1096_v7  ;;  %v930_v8 = vpop.f32.mrf.mxu1 }
 0x2b8   :  { %v3357_v53 = vadd.f32 %v3275_v14, %v930_v8  ;;  %v991_v54 = vsel %vm323_vm4, %v3349_v52, 0.0  ;;  %v1073_v58 = vmul.f32 %v3349_v52, %v3349_v52  ;;  %v1102_v62 = vsel %vm323_vm4, %v1070_v38, 0.0 }
 0x2b9   :  { %974 = vadd.xlane.f32.xlu0 %v973_v10  ;;  %v2427_v55 = vpop.f32.mrf.mxu1 }
 0x2ba   :  { %v985_v60 = vsel %vm323_vm4, %v3357_v53, 0.0  ;;  %v3369_v61 = vadd.f32 %v2427_v55, %v3275_v14  ;;  %v1111_v63 = vsel %vm323_vm4, %v1073_v58, 0.0  ;;  %v1071_v34 = vmul.f32 %v3357_v53, %v3357_v53 }
 0x2bb   :  { %1091 = vadd.xlane.f32.xlu1 %v1090_v12  ;;  %v943_v21 = vpop.f32.mrf.mxu1 }
 0x2bc   :  { %v3376_v40 = vadd.f32 %v3275_v14, %v943_v21  ;;  %v1000_v27 = vsel %vm323_vm4, %v3369_v61, 0.0  ;;  %v1105_v45 = vsel %vm323_vm4, %v1071_v34, 0.0  ;;  %v1076_v17 = vmul.f32 %v3369_v61, %v3369_v61 }
 0x2bd   :  { %1100 = vadd.xlane.f32.xlu0 %v1099_v49  ;;  %v2428_v51 = vpop.f32.mrf.mxu1 }
 0x2be   :  { %v3381_v1 = vadd.f32 %v2428_v51, %v3275_v14  ;;  %v994_v3 = vsel %vm323_vm4, %v3376_v40, 0.0  ;;  %v1074_v6 = vmul.f32 %v3376_v40, %v3376_v40 }
 0x2bf   :  { %989 = vadd.xlane.f32.xlu1 %v988_v50  ;;  %v946_v2 = vpop.f32.mrf.mxu1 }
 0x2c0   :  { %v3389_v5 = vadd.f32 %v3275_v14, %v946_v2  ;;  %v1003_v22 = vsel %vm323_vm4, %v3381_v1, 0.0  ;;  %v1114_v0 = vsel %vm323_vm4, %v1074_v6, 0.0  ;;  %v1120_v14 = vsel %vm323_vm4, %v1076_v17, 0.0 }
 0x2c1   :  { %1094 = vadd.xlane.f32.xlu0 %v1093_v35  ;;  %v1077_v26 = vmul.f32 %v3381_v1, %v3381_v1 }
 0x2c2   :  { %v997_v18 = vsel %vm323_vm4, %v3389_v5, 0.0  ;;  %v1075_v19 = vmul.f32 %v3389_v5, %v3389_v5 }
 0x2c3   :  { %983 = vadd.xlane.f32.xlu1 %v982_v31  ;;  %v1123_v59 = vsel %vm323_vm4, %v1077_v26, 0.0 }
 0x2c4   :  { %v1117_v23 = vsel %vm323_vm4, %v1075_v19, 0.0 }
 0x2c5   :  { %992 = vadd.xlane.f32.xlu0 %v991_v54 }
 0x2c7   :  { %1109 = vadd.xlane.f32.xlu1 %v1108_v44 }
 0x2c9   :  { %986 = vadd.xlane.f32.xlu0 %v985_v60 }
 0x2cb   :  { %1103 = vadd.xlane.f32.xlu1 %v1102_v62 }
 0x2cd   :  { %1112 = vadd.xlane.f32.xlu0 %v1111_v63 }
 0x2cf   :  { %1001 = vadd.xlane.f32.xlu1 %v1000_v27 }
 0x2d1   :  { %1106 = vadd.xlane.f32.xlu0 %v1105_v45 }
 0x2d3   :  { %995 = vadd.xlane.f32.xlu1 %v994_v3 }
 0x2d5   :  { %1004 = vadd.xlane.f32.xlu0 %v1003_v22 }
 0x2d7   :  { %1115 = vadd.xlane.f32.xlu1 %v1114_v0 }
 0x2d9   :  { %998 = vadd.xlane.f32.xlu0 %v997_v18 }
 0x2db   :  { %1121 = vadd.xlane.f32.xlu1 %v1120_v14 }
 0x2dd   :  { %1118 = vadd.xlane.f32.xlu0 %v1117_v23 }
 0x2e1   :  { %1124 = vadd.xlane.f32.xlu0 %v1123_v59 }
 0x32a   :  { %v966_v42 = vpop.xlane.xlu0 %965 }
 0x32c   :  { %v1086_v4 = vpop.xlane.xlu1 %1085 }
 0x32e   :  { %v960_v33 = vpop.xlane.xlu0 %959 }
 0x330   :  { %v1080_v57 = vpop.xlane.xlu1 %1079 }
 0x332   :  { %v969_v37 = vpop.xlane.xlu0 %968 }
 0x333   :  { %v1013_v46 = vadd.f32 %v969_v37, %v966_v42 }
 0x334   :  { %v963_v47 = vpop.xlane.xlu1 %962 }
 0x335   :  { %v1014_v7 = vrot.slane %v1013_v46, 4  ;;  %v1006_v20 = vadd.f32 %v963_v47, %v960_v33 }
 0x336   :  { %v1089_v10 = vpop.xlane.xlu0 %1088 }
 0x337   :  { %v1015_v30 = vadd.f32 %v1014_v7, %v1013_v46  ;;  %v1007_v24 = vrot.slane %v1006_v20, 4  ;;  %v1133_v12 = vadd.f32 %v1089_v10, %v1086_v4 }
 0x338   :  { %v978_v49 = vpop.xlane.xlu1 %977 }
 0x339   :  { %v1016_v25 = vrot.slane %v1015_v30, 2  ;;  %v1008_v36 = vadd.f32 %v1007_v24, %v1006_v20  ;;  %v1134_v50 = vrot.slane %v1133_v12, 4 }
 0x33a   :  { %v1083_v35 = vpop.xlane.xlu0 %1082 }
 0x33b   :  { %v1017_v8 = vadd.f32 %v1016_v25, %v1015_v30  ;;  %v1009_v31 = vrot.slane %v1008_v36, 2  ;;  %v1135_v43 = vadd.f32 %v1134_v50, %v1133_v12  ;;  %v1126_v54 = vadd.f32 %v1083_v35, %v1080_v57 }
 0x33c   :  { %v972_v55 = vpop.xlane.xlu1 %971 }
 0x33d   :  { %v1018_v44 = vrot.slane %v1017_v8, 1  ;;  %v1010_v38 = vadd.f32 %v1009_v31, %v1008_v36  ;;  %v1136_v60 = vrot.slane %v1135_v43, 2  ;;  %v1127_v58 = vrot.slane %v1126_v54, 4 }
 0x33e   :  { %v981_v21 = vpop.xlane.xlu0 %980 }
 0x33f   :  { %v1019_v62 = vadd.f32 %v1018_v44, %v1017_v8  ;;  %v1011_v63 = vrot.slane %v1010_v38, 1  ;;  %v1137_v34 = vadd.f32 %v1136_v60, %v1135_v43  ;;  %v1128_v51 = vadd.f32 %v1127_v58, %v1126_v54 }
 0x340   :  { %v1027_v27 = vadd.f32 %v981_v21, %v978_v49  ;;  %v1098_v45 = vpop.xlane.xlu1 %1097 }
 0x341   :  { %v3410_v2 = vmul.f32 0.0078125, %v1019_v62  ;;  %v1012_v3 = vadd.f32 %v1011_v63, %v1010_v38  ;;  %v1138_v6 = vrot.slane %v1137_v34, 1  ;;  %v1129_v22 = vrot.slane %v1128_v51, 2 }
 0x342   :  { %v1028_v0 = vrot.slane %v1027_v27, 4  ;;  %v975_v17 = vpop.xlane.xlu0 %974 }
 0x343   :  { %v1139_v18 = vadd.f32 %v1138_v6, %v1137_v34  ;;  %v1130_v19 = vadd.f32 %v1129_v22, %v1128_v51  ;;  %v1020_v23 = vadd.f32 %v975_v17, %v972_v55  ;;  %v3412_v59 = vmul.f32 0.0078125, %v1012_v3 }
 0x344   :  { %v1029_v14 = vadd.f32 %v1028_v0, %v1027_v27  ;;  %v1092_v26 = vpop.xlane.xlu1 %1091  ;;  %v1199_v28 = vmul.f32 %v3410_v2, %v3410_v2 }
 0x345   :  { %v1191_v42 = vmul.f32 0.0078125, %v1139_v18  ;;  %v1131_v32 = vrot.slane %v1130_v19, 1  ;;  %v1021_v33 = vrot.slane %v1020_v23, 4  ;;  %v1198_v30 = vmul.f32 %v3412_v59, %v3412_v59 }
 0x346   :  { %v1030_v4 = vrot.slane %v1029_v14, 2  ;;  %v1101_v57 = vpop.xlane.xlu0 %1100 }
 0x347   :  { %v1147_v37 = vadd.f32 %v1101_v57, %v1098_v45  ;;  %v1207_v46 = vsub.f32 %v1191_v42, %v1199_v28  ;;  %v1132_v47 = vadd.f32 %v1131_v32, %v1130_v19  ;;  %v1022_v20 = vadd.f32 %v1021_v33, %v1020_v23 }
 0x348   :  { %v1031_v7 = vadd.f32 %v1030_v4, %v1029_v14  ;;  %v990_v10 = vpop.xlane.xlu1 %989  ;;  %v1216_v57 = vsub.f32 %v3278_v56, %v3410_v2  ;;  %v3437_v56 = vld [vmem:[%s4063_s2 + $0x2] ss:$0 sm:$0xff] }
 0x349   :  { %v1148_v24 = vrot.slane %v1147_v37, 4  ;;  %v1231_v12 = vadd.f32 1e-05, %v1207_v46  ;;  %v1190_v49 = vmul.f32 0.0078125, %v1132_v47  ;;  %v1023_v36 = vrot.slane %v1022_v20, 2 }
 0x34a   :  { %v1032_v25 = vrot.slane %v1031_v7, 1  ;;  %v1095_v50 = vpop.xlane.xlu0 %1094 }
 0x34b   :  { %v1149_v35 = vadd.f32 %v1148_v24, %v1147_v37  ;;  %v1140_v8 = vadd.f32 %v1095_v50, %v1092_v26  ;;  %2719 = vrsqrt.f32 %v1231_v12  ;;  %v1206_v31 = vsub.f32 %v1190_v49, %v1198_v30 }
 0x34c   :  { %v1033_v43 = vadd.f32 %v1032_v25, %v1031_v7  ;;  %v1024_v54 = vadd.f32 %v1023_v36, %v1022_v20  ;;  %v984_v55 = vpop.xlane.xlu1 %983  ;;  %v1217_v37 = vsub.f32 %v3291_v9, %v3410_v2  ;;  %v1214_v30 = vsub.f32 %v3281_v13, %v3412_v59 }
 0x34d   :  { %v1150_v44 = vrot.slane %v1149_v35, 2  ;;  %v1141_v38 = vrot.slane %v1140_v8, 4  ;;  %v1230_v60 = vadd.f32 1e-05, %v1206_v31  ;;  %v1215_v24 = vsub.f32 %v3296_v16, %v3412_v59 }
 0x34e   :  { %v1025_v58 = vrot.slane %v1024_v54, 1  ;;  %v993_v21 = vpop.xlane.xlu0 %992  ;;  %v3418_v51 = vmul.f32 0.0078125, %v1033_v43 }
 0x34f   :  { %v1151_v62 = vadd.f32 %v1150_v44, %v1149_v35  ;;  %v1142_v63 = vadd.f32 %v1141_v38, %v1140_v8  ;;  %v1041_v34 = vadd.f32 %v993_v21, %v990_v10  ;;  %2721 = vrsqrt.f32 %v1230_v60  ;;  %v3446_v38 = vld [vmem:[%s4063_s2 + $0x3] ss:$0 sm:$0xff] }
 0x350   :  { %v1026_v27 = vadd.f32 %v1025_v58, %v1024_v54  ;;  %v1110_v45 = vpop.xlane.xlu1 %1109  ;;  %v1201_v26 = vmul.f32 %v3418_v51, %v3418_v51  ;;  %v1220_v13 = vsub.f32 %v3304_v15, %v3418_v51  ;;  %v1221_v43 = vsub.f32 %v3317_v41, %v3418_v51 }
 0x351   :  { %v1152_v3 = vrot.slane %v1151_v62, 1  ;;  %v1143_v6 = vrot.slane %v1142_v63, 2  ;;  %v1042_v22 = vrot.slane %v1041_v34, 4 }
 0x352   :  { %v987_v0 = vpop.xlane.xlu0 %986  ;;  %v3420_v23 = vmul.f32 0.0078125, %v1026_v27 }
 0x353   :  { %v1153_v17 = vadd.f32 %v1152_v3, %v1151_v62  ;;  %v1144_v18 = vadd.f32 %v1143_v6, %v1142_v63  ;;  %v1043_v19 = vadd.f32 %v1042_v22, %v1041_v34  ;;  %v1034_v14 = vadd.f32 %v987_v0, %v984_v55 }
 0x354   :  { %v1104_v28 = vpop.xlane.xlu1 %1103  ;;  %v1200_v12 = vmul.f32 %v3420_v23, %v3420_v23 }
 0x355   :  { %v1193_v42 = vmul.f32 0.0078125, %v1153_v17  ;;  %v1145_v32 = vrot.slane %v1144_v18, 1  ;;  %v1044_v4 = vrot.slane %v1043_v19, 2  ;;  %v1035_v33 = vrot.slane %v1034_v14, 4 }
 0x356   :  { %v1113_v46 = vpop.xlane.xlu0 %1112 }
 0x357   :  { %v1209_v47 = vsub.f32 %v1193_v42, %v1201_v26  ;;  %v1146_v7 = vadd.f32 %v1145_v32, %v1144_v18  ;;  %v1045_v20 = vadd.f32 %v1044_v4, %v1043_v19  ;;  %v1036_v10 = vadd.f32 %v1035_v33, %v1034_v14 }
 0x358   :  { %v1161_v49 = vadd.f32 %v1113_v46, %v1110_v45  ;;  %v2720_v9 = vpop.eup %2719  ;;  %v1002_v8 = vpop.xlane.xlu1 %1001  ;;  %v1218_v18 = vsub.f32 %v3312_v29, %v3420_v23  ;;  %v1219_v19 = vsub.f32 %v3325_v39, %v3420_v23 }
 0x359   :  { %v1233_v2 = vadd.f32 1e-05, %v1209_v47  ;;  %v1192_v25 = vmul.f32 0.0078125, %v1146_v7  ;;  %v1046_v36 = vrot.slane %v1045_v20, 1  ;;  %v1037_v50 = vrot.slane %v1036_v10, 2 }
 0x35a   :  { %v1162_v35 = vrot.slane %v1161_v49, 4  ;;  %v1107_v16 = vpop.xlane.xlu0 %1106  ;;  %v1248_v59 = vmul.f32 %v2720_v9, %v1216_v57  ;;  %v1249_v31 = vmul.f32 %v2720_v9, %v1217_v37 }
 0x35b   :  { %v1208_v54 = vsub.f32 %v1192_v25, %v1200_v12  ;;  %v1047_v55 = vadd.f32 %v1046_v36, %v1045_v20  ;;  %v1038_v44 = vadd.f32 %v1037_v50, %v1036_v10  ;;  %v1154_v58 = vadd.f32 %v1107_v16, %v1104_v28  ;;  %v2717_v36 = vld [vmem:[%s4062_s1 + $0x18] sm:$0xff]  }
 0x35c   :  { %v1163_v60 = vadd.f32 %v1162_v35, %v1161_v49  ;;  %v1269_v21 = vmul.f32 %v3437_v56, %v1248_v59  ;;  %v1270_v62 = vmul.f32 %v3437_v56, %v1249_v31  ;;  %2723 = vrsqrt.f32 %v1233_v2  ;;  %v2722_v45 = vpop.eup %2721  ;;  %v996_v32 = vpop.xlane.xlu1 %995  ;;  %2431 = vmatprep.subr.bf16.mxu0 %v2717_v36 }
 0x35d   :  { %v1232_v63 = vadd.f32 1e-05, %v1208_v54  ;;  %v3450_v34 = vmul.f32 0.0078125, %v1047_v55  ;;  %v1039_v27 = vrot.slane %v1038_v44, 1  ;;  %v1155_v6 = vrot.slane %v1154_v58, 4  ;;  %2432 = vmatpush3.bf16.msra.mxu0 %v2717_v36 }
 0x35e   :  { %v1164_v3 = vrot.slane %v1163_v60, 2  ;;  %v1005_v22 = vpop.xlane.xlu0 %1004  ;;  %v1290_v0 = vadd.f32 %v3446_v38, %v1269_v21  ;;  %v1291_v17 = vadd.f32 %v3446_v38, %v1270_v62  ;;  %v1246_v46 = vmul.f32 %v2722_v45, %v1214_v30 }
 0x35f   :  { %2725 = vrsqrt.f32 %v1232_v63  ;;  %v1040_v14 = vadd.f32 %v1039_v27, %v1038_v44  ;;  %v1224_v26 = vsub.f32 %v3337_v48, %v3450_v34  ;;  %v1156_v42 = vadd.f32 %v1155_v6, %v1154_v58 }
 0x360   :  { %v1165_v28 = vadd.f32 %v1164_v3, %v1163_v60  ;;  %v1055_v4 = vadd.f32 %v1005_v22, %v1002_v8  ;;  %v1306_v57 = vmax.f32 %v1290_v0, 0.0  ;;  %v1307_v37 = vmax.f32 %v1291_v17, 0.0  ;;  %v1116_v60 = vpop.xlane.xlu1 %1115 }
 0x361   :  { %v3460_v33 = vmul.f32 0.0078125, %v1040_v14  ;;  %v1157_v7 = vrot.slane %v1156_v42, 2  ;;  %v1247_v12 = vmul.f32 %v2722_v45, %v1215_v24  ;;  %v1225_v49 = vsub.f32 %v3349_v52, %v3450_v34 }
 0x362   :  { %v1166_v47 = vrot.slane %v1165_v28, 1  ;;  %v1056_v20 = vrot.slane %v1055_v4, 4  ;;  %v999_v10 = vpop.xlane.xlu0 %998  ;;  %v1203_v9 = vmul.f32 %v3450_v34, %v3450_v34  ;;  %v1339_v8 = vrot.slane %v1306_v57, 7 }
 0x363   :  { %v1202_v2 = vmul.f32 %v3460_v33, %v3460_v33  ;;  %v1048_v25 = vadd.f32 %v999_v10, %v996_v32  ;;  %v1158_v50 = vadd.f32 %v1157_v7, %v1156_v42  ;;  %v1340_v24 = vrot.slane %v1307_v37, 7 }
 0x364   :  { %v1167_v30 = vadd.f32 %v1166_v47, %v1165_v28  ;;  %v1057_v35 = vadd.f32 %v1056_v20, %v1055_v4  ;;  %v1267_v59 = vmul.f32 %v3437_v56, %v1246_v46  ;;  %v1268_v31 = vmul.f32 %v3437_v56, %v1247_v12 }
 0x365   :  { %v1049_v16 = vrot.slane %v1048_v25, 4  ;;  %v1159_v55 = vrot.slane %v1158_v50, 1  ;;  %v3474_v21 = vsel %vm47_vm0, 0.0, %v1339_v8  ;;  %v3477_v27 = vsel %vm47_vm0, %v1339_v8, %v1340_v24 }
 0x366   :  { %v1195_v54 = vmul.f32 0.0078125, %v1167_v30  ;;  %v1058_v44 = vrot.slane %v1057_v35, 2  ;;  %v1119_v58 = vpop.xlane.xlu0 %1118  ;;  %v3480_v45 = vsel %vm47_vm0, %v1340_v24, 0.0  ;;  %v1421_v0 = vrot.slane %v3474_v21, 1  ;;  %v1122_v30 = vpop.xlane.xlu1 %1121 }
 0x367   :  { %v1050_v62 = vadd.f32 %v1049_v16, %v1048_v25  ;;  %v1168_v63 = vadd.f32 %v1119_v58, %v1116_v60  ;;  %v1160_v6 = vadd.f32 %v1159_v55, %v1158_v50  ;;  %v1422_v28 = vrot.slane %v3477_v27, 1 }
 0x368   :  { %v1211_v3 = vsub.f32 %v1195_v54, %v1203_v9  ;;  %v1059_v22 = vadd.f32 %v1058_v44, %v1057_v35  ;;  %v1424_v42 = vrot.slane %v3480_v45, 1  ;;  %v1288_v47 = vadd.f32 %v3446_v38, %v1267_v59 }
 0x369   :  { %v1051_v17 = vrot.slane %v1050_v62, 2  ;;  %v1169_v14 = vrot.slane %v1168_v63, 4  ;;  %v3485_v32 = vpop.eup %2723  ;;  %v1194_v57 = vmul.f32 0.0078125, %v1160_v6  ;;  %v1423_v10 = vsel %vm128_vm1, %v1421_v0, %v1422_v28 }
 0x36a   :  { %v1235_v4 = vadd.f32 1e-05, %v1211_v3  ;;  %v1060_v37 = vrot.slane %v1059_v22, 1  ;;  %v1125_v46 = vpop.xlane.xlu0 %1124  ;;  %v1425_v12 = vsel %vm128_vm1, %v1422_v28, %v1424_v42  ;;  %v1289_v24 = vadd.f32 %v3446_v38, %v1268_v31 }
 0x36b   :  { %v1052_v7 = vadd.f32 %v1051_v17, %v1050_v62  ;;  %v1170_v20 = vadd.f32 %v1169_v14, %v1168_v63  ;;  %v1210_v25 = vsub.f32 %v1194_v57, %v1202_v2  ;;  %v2633_v50 = vpack.i.bf16 %v1425_v12, %v1423_v10 }
 0x36c   :  { %v3490_v9 = vpop.eup %2725  ;;  %2727 = vrsqrt.f32 %v1235_v4  ;;  %v1061_v36 = vadd.f32 %v1060_v37, %v1059_v22  ;;  %v1175_v16 = vadd.f32 %v1125_v46, %v1122_v30  ;;  %v1222_v59 = vsub.f32 %v3344_v11, %v3460_v33 }
 0x36d   :  { %v1053_v35 = vrot.slane %v1052_v7, 1  ;;  %v1171_v8 = vrot.slane %v1170_v20, 2  ;;  %v1234_v54 = vadd.f32 1e-05, %v1210_v25  ;;  %2634 = vrot.lane.b32.xlu0 %v2633_v50, %s2752_s4  ;;  %v1304_v44 = vmax.f32 %v1288_v47, 0.0 }
 0x36e   :  { %v3495_v55 = vmul.f32 0.0078125, %v1061_v36  ;;  %v1176_v2 = vrot.slane %v1175_v16, 4  ;;  %v1305_v62 = vmax.f32 %v1289_v24, 0.0  ;;  %v1223_v63 = vsub.f32 %v3357_v53, %v3460_v33 }
 0x36f   :  { %v1054_v60 = vadd.f32 %v1053_v35, %v1052_v7  ;;  %v1172_v58 = vadd.f32 %v1171_v8, %v1170_v20  ;;  %2729 = vrsqrt.f32 %v1234_v54  ;;  %v1509_v3 = vrot.slane %v3474_v21, 2 }
 0x370   :  { %v1228_v31 = vsub.f32 %v3369_v61, %v3495_v55  ;;  %v1177_v0 = vadd.f32 %v1176_v2, %v1175_v16  ;;  %v1336_v17 = vrot.slane %v1304_v44, 7  ;;  %v1229_v14 = vsub.f32 %v3381_v1, %v3495_v55 }
 0x371   :  { %v3503_v6 = vmul.f32 0.0078125, %v1054_v60  ;;  %v1173_v22 = vrot.slane %v1172_v58, 1  ;;  %v1205_v28 = vmul.f32 %v3495_v55, %v3495_v55  ;;  %v1337_v42 = vrot.slane %v1305_v62, 7 }
 0x372   :  { %v1510_v4 = vrot.slane %v3477_v27, 2  ;;  %v1512_v46 = vrot.slane %v3480_v45, 2  ;;  %v1252_v47 = vmul.f32 %v3485_v32, %v1220_v13  ;;  %v1178_v7 = vrot.slane %v1177_v0, 2 }
 0x373   :  { %v1204_v57 = vmul.f32 %v3503_v6, %v3503_v6  ;;  %v1174_v37 = vadd.f32 %v1173_v22, %v1172_v58  ;;  %v3518_v20 = vsel %vm47_vm0, %v1336_v17, %v1337_v42  ;;  %v3521_v10 = vsel %vm47_vm0, 0.0, %v1336_v17 }
 0x374   :  { %v1392_v12 = vsel %vm47_vm0, %v1337_v42, 0.0  ;;  %v1416_v36 = vrot.slane %v3521_v10, 1  ;;  %v1417_v30 = vrot.slane %v3518_v20, 1  ;;  %v1179_v50 = vadd.f32 %v1178_v7, %v1177_v0 }
 0x375   :  { %v1196_v25 = vmul.f32 0.0078125, %v1174_v37  ;;  %v1419_v45 = vrot.slane %v1392_v12, 1  ;;  %v1504_v15 = vrot.slane %v3521_v10, 2  ;;  %v1505_v13 = vrot.slane %v3518_v20, 2 }
 0x376   :  { %v1507_v35 = vrot.slane %v1392_v12, 2  ;;  %v1418_v16 = vsel %vm128_vm1, %v1416_v36, %v1417_v30  ;;  %v1511_v54 = vsel %vm217_vm2, %v1509_v3, %v1510_v4  ;;  %v1180_v44 = vrot.slane %v1179_v50, 1 }
 0x377   :  { %v1212_v8 = vsub.f32 %v1196_v25, %v1204_v57  ;;  %v1420_v24 = vsel %vm128_vm1, %v1417_v30, %v1419_v45  ;;  %v1506_v58 = vsel %vm217_vm2, %v1504_v15, %v1505_v13  ;;  %v1226_v22 = vsub.f32 %v3376_v40, %v3503_v6 }
 0x378   :  { %v2638_v60 = vpack.i.bf16 %v1420_v24, %v1418_v16  ;;  %v1508_v2 = vsel %vm217_vm2, %v1505_v13, %v1507_v35  ;;  %v1513_v17 = vsel %vm217_vm2, %v1510_v4, %v1512_v46  ;;  %v1253_v42 = vmul.f32 %v3485_v32, %v1221_v43 }
 0x379   :  { %v2728_v62 = vpop.eup %2727  ;;  %v1236_v0 = vadd.f32 1e-05, %v1212_v8  ;;  %v1181_v57 = vadd.f32 %v1180_v44, %v1179_v50  ;;  %v2643_v3 = vpack.i.bf16 %v1508_v2, %v1506_v58  ;;  %v1273_v37 = vmul.f32 %v3437_v56, %v1252_v47 }
 0x37a   :  { %2639 = vrot.lane.b32.xlu1 %v2638_v60, %s2752_s4  ;;  %v1250_v7 = vmul.f32 %v3490_v9, %v1218_v18  ;;  %v2648_v12 = vpack.i.bf16 %v1513_v17, %v1511_v54  ;;  %v1274_v25 = vmul.f32 %v3437_v56, %v1253_v42  ;;  %v1251_v41 = vmul.f32 %v3490_v9, %v1219_v19 }
 0x37b   :  { %v1256_v51 = vmul.f32 %v2728_v62, %v1224_v26  ;;  %v1197_v43 = vmul.f32 0.0078125, %v1181_v57  ;;  %v1294_v32 = vadd.f32 %v3446_v38, %v1273_v37  ;;  %v1257_v29 = vmul.f32 %v2728_v62, %v1225_v49 }
 0x37c   :  { %v1271_v4 = vmul.f32 %v3437_v56, %v1250_v7  ;;  %v2730_v18 = vpop.eup %2729  ;;  %2731 = vrsqrt.f32 %v1236_v0  ;;  %v1295_v46 = vadd.f32 %v3446_v38, %v1274_v25  ;;  %v1272_v39 = vmul.f32 %v3437_v56, %v1251_v41 }
 0x37d   :  { %v1277_v23 = vmul.f32 %v3437_v56, %v1256_v51  ;;  %v1213_v19 = vsub.f32 %v1197_v43, %v1205_v28  ;;  %v1310_v48 = vmax.f32 %v1294_v32, 0.0  ;;  %v1278_v9 = vmul.f32 %v3437_v56, %v1257_v29 }
 0x37e   :  { %2644 = vrot.lane.b32.xlu1 %v2643_v3, %s2753_s22  ;;  %v1292_v26 = vadd.f32 %v3446_v38, %v1271_v4  ;;  %v1311_v47 = vmax.f32 %v1295_v46, 0.0  ;;  %v1293_v52 = vadd.f32 %v3446_v38, %v1272_v39  ;;  %v1254_v49 = vmul.f32 %v2730_v18, %v1222_v59 }
 0x37f   :  { %v1298_v34 = vadd.f32 %v3446_v38, %v1277_v23  ;;  %v1237_v36 = vadd.f32 1e-05, %v1213_v19  ;;  %v1345_v30 = vrot.slane %v1310_v48, 7  ;;  %v1299_v28 = vadd.f32 %v3446_v38, %v1278_v9 }
 0x380   :  { %v1308_v45 = vmax.f32 %v1292_v26, 0.0  ;;  %v1346_v50 = vrot.slane %v1311_v47, 7  ;;  %v1309_v15 = vmax.f32 %v1293_v52, 0.0  ;;  %v1255_v35 = vmul.f32 %v2730_v18, %v1223_v63 }
 0x381   :  { %v1314_v13 = vmax.f32 %v1298_v34, 0.0  ;;  %2733 = vrsqrt.f32 %v1237_v36  ;;  %v3576_v8 = vsel %vm47_vm0, 0.0, %v1345_v30  ;;  %v1315_v59 = vmax.f32 %v1299_v28, 0.0 }
 0x382   :  { %2649 = vrot.lane.b32.xlu1 %v2648_v12, %s2753_s22  ;;  %v1342_v11 = vrot.slane %v1308_v45, 7  ;;  %v3579_v16 = vsel %vm47_vm0, %v1345_v30, %v1346_v50  ;;  %v1395_v24 = vsel %vm47_vm0, %v1346_v50, 0.0  ;;  %v1431_v54 = vrot.slane %v3576_v8, 1 }
 0x383   :  { %v1519_v44 = vrot.slane %v3576_v8, 2  ;;  %v1432_v53 = vrot.slane %v3579_v16, 1  ;;  %v1434_v33 = vrot.slane %v1395_v24, 1  ;;  %v1520_v63 = vrot.slane %v3579_v16, 2 }
 0x384   :  { %v1522_v60 = vrot.slane %v1395_v24, 2  ;;  %v1343_v58 = vrot.slane %v1309_v15, 7  ;;  %v3587_v2 = vsel %vm47_vm0, 0.0, %v1342_v11  ;;  %v1351_v62 = vrot.slane %v1314_v13, 7 }
 0x385   :  { %v1352_v0 = vrot.slane %v1315_v59, 7  ;;  %v1433_v17 = vsel %vm128_vm1, %v1431_v54, %v1432_v53  ;;  %v1435_v42 = vsel %vm128_vm1, %v1432_v53, %v1434_v33  ;;  %v1521_v57 = vsel %vm217_vm2, %v1519_v44, %v1520_v63 }
 0x386   :  { %v1523_v3 = vsel %vm217_vm2, %v1520_v63, %v1522_v60  ;;  %v2653_v37 = vpack.i.bf16 %v1435_v42, %v1433_v17  ;;  %v3594_v12 = vsel %vm47_vm0, %v1342_v11, %v1343_v58  ;;  %v1394_v25 = vsel %vm47_vm0, %v1343_v58, 0.0 }
 0x387   :  { %v2658_v7 = vpack.i.bf16 %v1523_v3, %v1521_v57  ;;  %v1426_v41 = vrot.slane %v3587_v2, 1  ;;  %v1427_v51 = vrot.slane %v3594_v12, 1  ;;  %v1429_v43 = vrot.slane %v1394_v25, 1 }
 0x388   :  { %v1514_v32 = vrot.slane %v3587_v2, 2  ;;  %2654 = vrot.lane.b32.xlu1 %v2653_v37, %s2752_s4  ;;  %v1515_v4 = vrot.slane %v3594_v12, 2  ;;  %v1517_v29 = vrot.slane %v1394_v25, 2  ;;  %v3603_v18 = vsel %vm47_vm0, %v1351_v62, %v1352_v0 }
 0x389   :  { %v3606_v46 = vsel %vm47_vm0, 0.0, %v1351_v62  ;;  %v2732_v39 = vpop.eup %2731  ;;  %v1428_v23 = vsel %vm128_vm1, %v1426_v41, %v1427_v51  ;;  %v1430_v19 = vsel %vm128_vm1, %v1427_v51, %v1429_v43  ;;  %v1397_v48 = vsel %vm47_vm0, %v1352_v0, 0.0 }
 0x38a   :  { %v1441_v26 = vrot.slane %v3606_v46, 1  ;;  %v2663_v9 = vpack.i.bf16 %v1430_v19, %v1428_v23  ;;  %v1516_v47 = vsel %vm217_vm2, %v1514_v32, %v1515_v4  ;;  %v1518_v52 = vsel %vm217_vm2, %v1515_v4, %v1517_v29 }
 0x38b   :  { %v1442_v34 = vrot.slane %v3603_v18, 1  ;;  %v1227_v36 = vsub.f32 %v3389_v5, %v3503_v6  ;;  %v1444_v30 = vrot.slane %v1397_v48, 1  ;;  %v1529_v45 = vrot.slane %v3606_v46, 2 }
 0x38c   :  { %v1530_v28 = vrot.slane %v3603_v18, 2  ;;  %2659 = vrot.lane.b32.xlu1 %v2658_v7, %s2753_s22  ;;  %2664 = vrot.lane.b32.xlu0 %v2663_v9, %s2752_s4  ;;  %v1532_v15 = vrot.slane %v1397_v48, 2  ;;  %v1275_v13 = vmul.f32 %v3437_v56, %v1254_v49  ;;  %v1276_v11 = vmul.f32 %v3437_v56, %v1255_v35 }
 0x38d   :  { %v1443_v50 = vsel %vm128_vm1, %v1441_v26, %v1442_v34  ;;  %v2668_v59 = vpack.i.bf16 %v1518_v52, %v1516_v47  ;;  %v1445_v24 = vsel %vm128_vm1, %v1442_v34, %v1444_v30  ;;  %v1258_v5 = vmul.f32 %v2732_v39, %v1226_v22 }
 0x38e   :  { %v1259_v54 = vmul.f32 %v2732_v39, %v1227_v36  ;;  %v2734_v44 = vpop.eup %2733  ;;  %v2673_v53 = vpack.i.bf16 %v1445_v24, %v1443_v50  ;;  %v1531_v33 = vsel %vm217_vm2, %v1529_v45, %v1530_v28  ;;  %v1296_v63 = vadd.f32 %v3446_v38, %v1275_v13 }
 0x38f   :  { %v1297_v60 = vadd.f32 %v3446_v38, %v1276_v11  ;;  %v1533_v49 = vsel %vm217_vm2, %v1530_v28, %v1532_v15  ;;  %v1279_v35 = vmul.f32 %v3437_v56, %v1258_v5  ;;  %v1260_v40 = vmul.f32 %v2734_v44, %v1228_v31 }
 0x390   :  { %v1280_v58 = vmul.f32 %v3437_v56, %v1259_v54  ;;  %2669 = vrot.lane.b32.xlu0 %v2668_v59, %s2753_s22  ;;  %2674 = vrot.lane.b32.xlu1 %v2673_v53, %s2752_s4  ;;  %v1312_v6 = vmax.f32 %v1296_v63, 0.0  ;;  %v1261_v62 = vmul.f32 %v2734_v44, %v1229_v14  ;;  %v2678_v57 = vpack.i.bf16 %v1533_v49, %v1531_v33 }
 0x391   :  { %v1313_v22 = vmax.f32 %v1297_v60, 0.0  ;;  %v1300_v0 = vadd.f32 %v3446_v38, %v1279_v35  ;;  %v1281_v42 = vmul.f32 %v3437_v56, %v1260_v40 }
 0x392   :  { %v1301_v17 = vadd.f32 %v3446_v38, %v1280_v58  ;;  %v1348_v3 = vrot.slane %v1312_v6, 7  ;;  %v1282_v31 = vmul.f32 %v3437_v56, %v1261_v62 }
 0x393   :  { %v1349_v61 = vrot.slane %v1313_v22, 7  ;;  %v1316_v37 = vmax.f32 %v1300_v0, 0.0  ;;  %v1302_v25 = vadd.f32 %v3446_v38, %v1281_v42 }
 0x394   :  { %v1317_v7 = vmax.f32 %v1301_v17, 0.0  ;;  %2679 = vrot.lane.b32.xlu1 %v2678_v57, %s2753_s22  ;;  %v3652_v55 = vsel %vm47_vm0, 0.0, %v1348_v3  ;;  %v1303_v41 = vadd.f32 %v3446_v38, %v1282_v31 }
 0x395   :  { %v3649_v1 = vsel %vm47_vm0, %v1348_v3, %v1349_v61  ;;  %v1396_v14 = vsel %vm47_vm0, %v1349_v61, 0.0  ;;  %v1436_v51 = vrot.slane %v3652_v55, 1  ;;  %v1524_v32 = vrot.slane %v3652_v55, 2 }
 0x396   :  { %v1437_v56 = vrot.slane %v3649_v1, 1  ;;  %v1439_v43 = vrot.slane %v1396_v14, 1  ;;  %v1525_v4 = vrot.slane %v3649_v1, 2  ;;  %v1527_v29 = vrot.slane %v1396_v14, 2 }
 0x397   :  { %v1354_v39 = vrot.slane %v1316_v37, 7  ;;  %v1355_v23 = vrot.slane %v1317_v7, 7  ;;  %v1318_v26 = vmax.f32 %v1302_v25, 0.0  ;;  %v1319_v9 = vmax.f32 %v1303_v41, 0.0 }
 0x398   :  { %v1438_v19 = vsel %vm128_vm1, %v1436_v51, %v1437_v56  ;;  %v1440_v48 = vsel %vm128_vm1, %v1437_v56, %v1439_v43  ;;  %v1526_v38 = vsel %vm217_vm2, %v1524_v32, %v1525_v4  ;;  %v1528_v34 = vsel %vm217_vm2, %v1525_v4, %v1527_v29 }
 0x399   :  { %v2683_v47 = vpack.i.bf16 %v1440_v48, %v1438_v19  ;;  %v3664_v52 = vsel %vm47_vm0, %v1354_v39, %v1355_v23  ;;  %v3668_v36 = vsel %vm47_vm0, 0.0, %v1354_v39  ;;  %v1398_v30 = vsel %vm47_vm0, %v1355_v23, 0.0 }
 0x39a   :  { %v1447_v45 = vrot.slane %v3664_v52, 1  ;;  %v1446_v28 = vrot.slane %v3668_v36, 1  ;;  %v1449_v50 = vrot.slane %v1398_v30, 1  ;;  %v1357_v15 = vrot.slane %v1318_v26, 7 }
 0x39b   :  { %2684 = vrot.lane.b32.xlu0 %v2683_v47, %s2752_s4  ;;  %v1358_v13 = vrot.slane %v1319_v9, 7  ;;  %v2688_v11 = vpack.i.bf16 %v1528_v34, %v1526_v38  ;;  %v1534_v5 = vrot.slane %v3668_v36, 2  ;;  %v1535_v54 = vrot.slane %v3664_v52, 2 }
 0x39c   :  { %v1448_v59 = vsel %vm128_vm1, %v1446_v28, %v1447_v45  ;;  %v1450_v24 = vsel %vm128_vm1, %v1447_v45, %v1449_v50  ;;  %v1537_v44 = vrot.slane %v1398_v30, 2  ;;  %v3682_v33 = vsel %vm47_vm0, 0.0, %v1357_v15 }
 0x39d   :  { %v3679_v53 = vsel %vm47_vm0, %v1357_v15, %v1358_v13  ;;  %v2698_v63 = vpack.i.bf16 %v1450_v24, %v1448_v59  ;;  %v1399_v60 = vsel %vm47_vm0, %v1358_v13, 0.0  ;;  %v1451_v49 = vrot.slane %v3682_v33, 1 }
 0x39e   :  { %v1452_v35 = vrot.slane %v3679_v53, 1  ;;  %v1454_v58 = vrot.slane %v1399_v60, 1  ;;  %v1539_v40 = vrot.slane %v3682_v33, 2  ;;  %v1540_v6 = vrot.slane %v3679_v53, 2 }
 0x39f   :  { %2689 = vrot.lane.b32.xlu0 %v2688_v11, %s2753_s22  ;;  %v1542_v22 = vrot.slane %v1399_v60, 2  ;;  %v1536_v0 = vsel %vm217_vm2, %v1534_v5, %v1535_v54  ;;  %v1538_v17 = vsel %vm217_vm2, %v1535_v54, %v1537_v44 }
 0x3a0   :  { %v1453_v62 = vsel %vm128_vm1, %v1451_v49, %v1452_v35  ;;  %v1455_v42 = vsel %vm128_vm1, %v1452_v35, %v1454_v58  ;;  %v1541_v3 = vsel %vm217_vm2, %v1539_v40, %v1540_v6  ;;  %v2703_v31 = vpack.i.bf16 %v1538_v17, %v1536_v0 }
 0x3a1   :  { %v2693_v57 = vpack.i.bf16 %v1455_v42, %v1453_v62  ;;  %v1543_v61 = vsel %vm217_vm2, %v1540_v6, %v1542_v22 }
 0x3a2   :  { %v2708_v37 = vpack.i.bf16 %v1543_v61, %v1541_v3 }
 0x3a3   :  { %2699 = vrot.lane.b32.xlu0 %v2698_v63, %s2752_s4  ;;  %2694 = vrot.lane.b32.xlu1 %v2693_v57, %s2752_s4 }
 0x3a7   :  { %2704 = vrot.lane.b32.xlu0 %v2703_v31, %s2753_s22  ;;  %2709 = vrot.lane.b32.xlu1 %v2708_v37, %s2753_s22 }
 0x3df   :  { %v2635_v41 = vpop.permute.xlu0 %2634 }
 0x3e0   :  { %v2637_v32 = vunpack.i.h.bf16 %v2635_v41  ;;  %v2636_v4 = vunpack.i.l.bf16 %v2635_v41 }
 0x3e2   :  { %v1595_v38 = vsel %vm323_vm4, %v3477_v27, %v2637_v32  ;;  %v1594_v34 = vsel %vm323_vm4, %v3474_v21, %v2636_v4 }
 0x3ec   :  { %v2640_v7 = vpop.permute.xlu1 %2639 }
 0x3ed   :  { %v2642_v25 = vunpack.i.h.bf16 %v2640_v7  ;;  %v2641_v14 = vunpack.i.l.bf16 %v2640_v7 }
 0x3ef   :  { %v1593_v29 = vsel %vm323_vm4, %v3518_v20, %v2642_v25  ;;  %v1592_v39 = vsel %vm323_vm4, %v3521_v10, %v2641_v14 }
 0x3f0   :  { %v2645_v51 = vpop.permute.xlu1 %2644 }
 0x3f1   :  { %v2647_v56 = vunpack.i.h.bf16 %v2645_v51  ;;  %v2646_v43 = vunpack.i.l.bf16 %v2645_v51 }
 0x3f3   :  { %v1608_v23 = vsel %vm789_vm7, %v1592_v39, %v2646_v43  ;;  %v1609_v19 = vsel %vm789_vm7, %v1593_v29, %v2647_v56 }
 0x3f4   :  { %v1624_v48 = vpack.c.bf16 %v1609_v19, %v1608_v23  ;;  %v2650_v26 = vpop.permute.xlu1 %2649 }
 0x3f5   :  { %v2652_v9 = vunpack.i.h.bf16 %v2650_v26  ;;  %v2651_v47 = vunpack.i.l.bf16 %v2650_v26 }
 0x3f6   :  { %2433 = vmatprep.mubr.msk.bf16.mxu0 %vm832_vm8, %v1624_v48 }
 0x3f7   :  { %v1610_v20 = vsel %vm789_vm7, %v1594_v34, %v2651_v47  ;;  %v1611_v10 = vsel %vm789_vm7, %v1595_v38, %v2652_v9 }
 0x3f8   :  { %v1625_v30 = vpack.c.bf16 %v1611_v10, %v1610_v20 }
 0x3fa   :  { %2434 = vmatmul.mubr.msk.bf16.vlgmr.msra.gmra.mxu0 %vm832_vm8, %v1625_v30  ;;  %v2655_v45 = vpop.permute.xlu1 %2654 }
 0x3fb   :  { %v2657_v15 = vunpack.i.h.bf16 %v2655_v45  ;;  %v2656_v13 = vunpack.i.l.bf16 %v2655_v45 }
 0x3fd   :  { %v1599_v21 = vsel %vm323_vm4, %v3579_v16, %v2657_v15  ;;  %v1598_v54 = vsel %vm323_vm4, %v3576_v8, %v2656_v13 }
 0x3fe   :  { %v2660_v28 = vpop.permute.xlu1 %2659  ;;  %v2665_v50 = vpop.permute.xlu0 %2664 }
 0x3ff   :  { %v2662_v11 = vunpack.i.h.bf16 %v2660_v28  ;;  %v2661_v59 = vunpack.i.l.bf16 %v2660_v28  ;;  %v2667_v27 = vunpack.i.h.bf16 %v2665_v50  ;;  %v2666_v24 = vunpack.i.l.bf16 %v2665_v50 }
 0x401   :  { %v1614_v60 = vsel %vm789_vm7, %v1598_v54, %v2661_v59  ;;  %v1615_v49 = vsel %vm789_vm7, %v1599_v21, %v2662_v11  ;;  %v1597_v35 = vsel %vm323_vm4, %v3594_v12, %v2667_v27  ;;  %v1596_v58 = vsel %vm323_vm4, %v3587_v2, %v2666_v24 }
 0x402   :  { %v2670_v5 = vpop.permute.xlu0 %2669  ;;  %v2675_v16 = vpop.permute.xlu1 %2674  ;;  %v1627_v62 = vpack.c.bf16 %v1615_v49, %v1614_v60 }
 0x403   :  { %v2672_v44 = vunpack.i.h.bf16 %v2670_v5  ;;  %v2671_v63 = vunpack.i.l.bf16 %v2670_v5  ;;  %v2677_v17 = vunpack.i.h.bf16 %v2675_v16  ;;  %v2676_v42 = vunpack.i.l.bf16 %v2675_v16 }
 0x405   :  { %v1612_v40 = vsel %vm789_vm7, %v1596_v58, %v2671_v63  ;;  %v1613_v6 = vsel %vm789_vm7, %v1597_v35, %v2672_v44  ;;  %v1603_v31 = vsel %vm323_vm4, %v3603_v18, %v2677_v17  ;;  %v1602_v37 = vsel %vm323_vm4, %v3606_v46, %v2676_v42 }
 0x406   :  { %v1626_v22 = vpack.c.bf16 %v1613_v6, %v1612_v40  ;;  %v2680_v8 = vpop.permute.xlu1 %2679 }
 0x407   :  { %v2682_v57 = vunpack.i.h.bf16 %v2680_v8  ;;  %v2681_v12 = vunpack.i.l.bf16 %v2680_v8 }
 0x408   :  { %2437 = vmatprep.mubr.msk.bf16.mxu0 %vm832_vm8, %v1626_v22 }
 0x409   :  { %2438 = vmatmul.mubr.msk.bf16.gmra.mxu0 %vm832_vm8, %v1627_v62  ;;  %v1618_v14 = vsel %vm789_vm7, %v1602_v37, %v2681_v12  ;;  %v1619_v41 = vsel %vm789_vm7, %v1603_v31, %v2682_v57 }
 0x40a   :  { %v1629_v29 = vpack.c.bf16 %v1619_v41, %v1618_v14 }
 0x40d   :  { %v2685_v0 = vpop.permute.xlu0 %2684 }
 0x40e   :  { %v2687_v3 = vunpack.i.h.bf16 %v2685_v0  ;;  %v2686_v61 = vunpack.i.l.bf16 %v2685_v0 }
 0x410   :  { %v1601_v51 = vsel %vm323_vm4, %v3649_v1, %v2687_v3  ;;  %v1600_v56 = vsel %vm323_vm4, %v3652_v55, %v2686_v61 }
 0x411   :  { %v2690_v2 = vpop.permute.xlu0 %2689 }
 0x412   :  { %v2692_v7 = vunpack.i.h.bf16 %v2690_v2  ;;  %v2691_v25 = vunpack.i.l.bf16 %v2690_v2 }
 0x414   :  { %v1616_v43 = vsel %vm789_vm7, %v1600_v56, %v2691_v25  ;;  %v1617_v32 = vsel %vm789_vm7, %v1601_v51, %v2692_v7 }
 0x415   :  { %v1628_v18 = vpack.c.bf16 %v1617_v32, %v1616_v43  ;;  %v2700_v4 = vpop.permute.xlu0 %2699  ;;  %v2695_v23 = vpop.permute.xlu1 %2694 }
 0x416   :  { %v2702_v46 = vunpack.i.h.bf16 %v2700_v4  ;;  %v2701_v39 = vunpack.i.l.bf16 %v2700_v4  ;;  %v2697_v19 = vunpack.i.h.bf16 %v2695_v23  ;;  %v2696_v48 = vunpack.i.l.bf16 %v2695_v23 }
 0x417   :  { %2441 = vmatprep.mubr.msk.bf16.mxu0 %vm832_vm8, %v1628_v18 }
 0x418   :  { %2442 = vmatmul.mubr.msk.bf16.gmra.mxu0 %vm832_vm8, %v1629_v29  ;;  %v1605_v55 = vsel %vm323_vm4, %v3664_v52, %v2702_v46  ;;  %v1604_v47 = vsel %vm323_vm4, %v3668_v36, %v2701_v39  ;;  %v1607_v45 = vsel %vm323_vm4, %v3679_v53, %v2697_v19  ;;  %v1606_v28 = vsel %vm323_vm4, %v3682_v33, %v2696_v48  ;;  %v3759_v36 = vld [vmem:[%s4063_s2 + $0x4] ss:$0 sm:$0xff] }
 0x419   :  { %v2705_v1 = vpop.permute.xlu0 %2704  ;;  %v2710_v38 = vpop.permute.xlu1 %2709 }
 0x41a   :  { %v2707_v26 = vunpack.i.h.bf16 %v2705_v1  ;;  %v2706_v9 = vunpack.i.l.bf16 %v2705_v1  ;;  %v2712_v10 = vunpack.i.h.bf16 %v2710_v38  ;;  %v2711_v30 = vunpack.i.l.bf16 %v2710_v38 }
 0x41c   :  { %v1620_v34 = vsel %vm789_vm7, %v1604_v47, %v2706_v9  ;;  %v1621_v20 = vsel %vm789_vm7, %v1605_v55, %v2707_v26  ;;  %v1622_v15 = vsel %vm789_vm7, %v1606_v28, %v2711_v30  ;;  %v1623_v52 = vsel %vm789_vm7, %v1607_v45, %v2712_v10 }
 0x41d   :  { %v1630_v50 = vpack.c.bf16 %v1621_v20, %v1620_v34  ;;  %v1631_v13 = vpack.c.bf16 %v1623_v52, %v1622_v15 }
 0x41f   :  { %2445 = vmatprep.mubr.msk.bf16.mxu0 %vm832_vm8, %v1630_v50 }
 0x420   :  { %2446 = vmatmul.mubr.msk.bf16.gmra.mxu0 %vm832_vm8, %v1631_v13 }
 0x4ba   :  { %v2435_v11 = vpop.f32.mrf.mxu0 }
 0x4bb   :  { %v3762_v53 = vadd.f32 %v2435_v11, %v3759_v36 }
 0x4bc   :  { %v1711_v33 = vpop.f32.mrf.mxu0 }
 0x4bd   :  { %v3765_v59 = vadd.f32 %v3759_v36, %v1711_v33  ;;  %v1780_v27 = vsel %vm789_vm7, %v3762_v53, 0.0  ;;  %v1880_v24 = vmul.f32 %v3762_v53, %v3762_v53 }
 0x4be   :  { %1781 = vadd.xlane.f32.xlu0 %v1780_v27  ;;  %v2436_v5 = vpop.f32.mrf.mxu0 }
 0x4bf   :  { %v1900_v21 = vsel %vm789_vm7, %v1880_v24, 0.0  ;;  %v1878_v54 = vmul.f32 %v3765_v59, %v3765_v59  ;;  %v3775_v63 = vadd.f32 %v2436_v5, %v3759_v36  ;;  %v1774_v60 = vsel %vm789_vm7, %v3765_v59, 0.0 }
 0x4c0   :  { %1901 = vadd.xlane.f32.xlu1 %v1900_v21  ;;  %v1714_v44 = vpop.f32.mrf.mxu0 }
 0x4c1   :  { %v3780_v49 = vadd.f32 %v3759_v36, %v1714_v44  ;;  %v1894_v35 = vsel %vm789_vm7, %v1878_v54, 0.0  ;;  %v1783_v58 = vsel %vm789_vm7, %v3775_v63, 0.0  ;;  %v1881_v40 = vmul.f32 %v3775_v63, %v3775_v63 }
 0x4c2   :  { %1775 = vadd.xlane.f32.xlu0 %v1774_v60 }
 0x4c3   :  { %v1777_v6 = vsel %vm789_vm7, %v3780_v49, 0.0  ;;  %v1903_v16 = vsel %vm789_vm7, %v1881_v40, 0.0  ;;  %v1879_v22 = vmul.f32 %v3780_v49, %v3780_v49 }
 0x4c4   :  { %1895 = vadd.xlane.f32.xlu1 %v1894_v35 }
 0x4c5   :  { %v1897_v57 = vsel %vm789_vm7, %v1879_v22, 0.0 }
 0x4c6   :  { %1784 = vadd.xlane.f32.xlu0 %v1783_v58 }
 0x4c8   :  { %1778 = vadd.xlane.f32.xlu1 %v1777_v6 }
 0x4c9   :  { %v2439_v62 = vpop.f32.mrf.mxu0 }
 0x4ca   :  { %1904 = vadd.xlane.f32.xlu0 %v1903_v16  ;;  %v3793_v8 = vadd.f32 %v2439_v62, %v3759_v36 }
 0x4cb   :  { %v1727_v0 = vpop.f32.mrf.mxu0 }
 0x4cc   :  { %v3796_v17 = vadd.f32 %v3759_v36, %v1727_v0  ;;  %v1792_v42 = vsel %vm789_vm7, %v3793_v8, 0.0  ;;  %v1884_v7 = vmul.f32 %v3793_v8, %v3793_v8  ;;  %v2718_v0 = vld [vmem:[%s4062_s1 + $0x24] sm:$0xff]  }
 0x4cd   :  { %v2440_v12 = vpop.f32.mrf.mxu0  ;;  %1793 = vadd.xlane.f32.xlu1 %v1792_v42  ;;  %2449 = vmatprep.subr.bf16.mxu1 %v2718_v0 }
 0x4ce   :  { %1898 = vadd.xlane.f32.xlu0 %v1897_v57  ;;  %v3802_v3 = vadd.f32 %v2440_v12, %v3759_v36  ;;  %v1786_v31 = vsel %vm789_vm7, %v3796_v17, 0.0  ;;  %v1912_v25 = vsel %vm789_vm7, %v1884_v7, 0.0  ;;  %v1882_v41 = vmul.f32 %v3796_v17, %v3796_v17  ;;  %2450 = vmatpush3.bf16.msra.mxu1 %v2718_v0 }
 0x4cf   :  { %v1730_v61 = vpop.f32.mrf.mxu0 }
 0x4d0   :  { %v3805_v2 = vadd.f32 %v3759_v36, %v1730_v61  ;;  %v1795_v37 = vsel %vm789_vm7, %v3802_v3, 0.0  ;;  %v1885_v51 = vmul.f32 %v3802_v3, %v3802_v3  ;;  %v1906_v32 = vsel %vm789_vm7, %v1882_v41, 0.0 }
 0x4d1   :  { %1787 = vadd.xlane.f32.xlu1 %v1786_v31 }
 0x4d2   :  { %1796 = vadd.xlane.f32.xlu0 %v1795_v37  ;;  %v1789_v14 = vsel %vm789_vm7, %v3805_v2, 0.0  ;;  %v1915_v18 = vsel %vm789_vm7, %v1885_v51, 0.0  ;;  %v1883_v4 = vmul.f32 %v3805_v2, %v3805_v2 }
 0x4d4   :  { %v1909_v48 = vsel %vm789_vm7, %v1883_v4, 0.0 }
 0x4d5   :  { %1913 = vadd.xlane.f32.xlu1 %v1912_v25 }
 0x4d6   :  { %1790 = vadd.xlane.f32.xlu0 %v1789_v14 }
 0x4d8   :  { %v2443_v56 = vpop.f32.mrf.mxu0 }
 0x4d9   :  { %v3821_v43 = vadd.f32 %v2443_v56, %v3759_v36  ;;  %1907 = vadd.xlane.f32.xlu1 %v1906_v32 }
 0x4da   :  { %v1743_v29 = vpop.f32.mrf.mxu0  ;;  %1916 = vadd.xlane.f32.xlu0 %v1915_v18 }
 0x4db   :  { %v1804_v46 = vsel %vm789_vm7, %v3821_v43, 0.0  ;;  %v3830_v23 = vadd.f32 %v3759_v36, %v1743_v29  ;;  %v1888_v47 = vmul.f32 %v3821_v43, %v3821_v43 }
 0x4dc   :  { %v2444_v39 = vpop.f32.mrf.mxu0 }
 0x4dd   :  { %v3833_v19 = vadd.f32 %v2444_v39, %v3759_v36  ;;  %1805 = vadd.xlane.f32.xlu1 %v1804_v46  ;;  %v1798_v9 = vsel %vm789_vm7, %v3830_v23, 0.0  ;;  %v1924_v34 = vsel %vm789_vm7, %v1888_v47, 0.0  ;;  %v1886_v10 = vmul.f32 %v3830_v23, %v3830_v23 }
 0x4de   :  { %v1746_v1 = vpop.f32.mrf.mxu0  ;;  %1910 = vadd.xlane.f32.xlu0 %v1909_v48 }
 0x4df   :  { %v3837_v26 = vadd.f32 %v3759_v36, %v1746_v1  ;;  %v1807_v55 = vsel %vm789_vm7, %v3833_v19, 0.0  ;;  %v1889_v30 = vmul.f32 %v3833_v19, %v3833_v19  ;;  %v1918_v50 = vsel %vm789_vm7, %v1886_v10, 0.0 }
 0x4e0   :  { %v2447_v38 = vpop.f32.mrf.mxu0 }
 0x4e1   :  { %1799 = vadd.xlane.f32.xlu1 %v1798_v9  ;;  %v1801_v20 = vsel %vm789_vm7, %v3837_v26, 0.0  ;;  %v3853_v28 = vadd.f32 %v2447_v38, %v3759_v36  ;;  %v1927_v15 = vsel %vm789_vm7, %v1889_v30, 0.0  ;;  %v1887_v52 = vmul.f32 %v3837_v26, %v3837_v26 }
 0x4e2   :  { %1808 = vadd.xlane.f32.xlu0 %v1807_v55  ;;  %v1759_v45 = vpop.f32.mrf.mxu0 }
 0x4e3   :  { %v3860_v11 = vadd.f32 %v3759_v36, %v1759_v45  ;;  %v1816_v27 = vsel %vm789_vm7, %v3853_v28, 0.0  ;;  %v1921_v24 = vsel %vm789_vm7, %v1887_v52, 0.0 }
 0x4e4   :  { %v2448_v13 = vpop.f32.mrf.mxu0 }
 0x4e5   :  { %1925 = vadd.xlane.f32.xlu1 %v1924_v34  ;;  %v3863_v33 = vadd.f32 %v2448_v13, %v3759_v36  ;;  %v1810_v54 = vsel %vm789_vm7, %v3860_v11, 0.0  ;;  %v1890_v60 = vmul.f32 %v3860_v11, %v3860_v11 }
 0x4e6   :  { %1802 = vadd.xlane.f32.xlu0 %v1801_v20  ;;  %v1762_v5 = vpop.f32.mrf.mxu0 }
 0x4e7   :  { %v3869_v21 = vadd.f32 %v3759_v36, %v1762_v5  ;;  %v1819_v44 = vsel %vm789_vm7, %v3863_v33, 0.0  ;;  %v1930_v35 = vsel %vm789_vm7, %v1890_v60, 0.0  ;;  %v1892_v36 = vmul.f32 %v3853_v28, %v3853_v28 }
 0x4e8   :  { %v1893_v22 = vmul.f32 %v3863_v33, %v3863_v33 }
 0x4e9   :  { %1919 = vadd.xlane.f32.xlu1 %v1918_v50  ;;  %v1813_v58 = vsel %vm789_vm7, %v3869_v21, 0.0  ;;  %v1891_v40 = vmul.f32 %v3869_v21, %v3869_v21  ;;  %v1936_v6 = vsel %vm789_vm7, %v1892_v36, 0.0 }
 0x4ea   :  { %1928 = vadd.xlane.f32.xlu0 %v1927_v15  ;;  %v1939_v62 = vsel %vm789_vm7, %v1893_v22, 0.0 }
 0x4eb   :  { %v1933_v16 = vsel %vm789_vm7, %v1891_v40, 0.0 }
 0x4ed   :  { %1817 = vadd.xlane.f32.xlu1 %v1816_v27 }
 0x4ee   :  { %1922 = vadd.xlane.f32.xlu0 %v1921_v24 }
 0x4f1   :  { %1811 = vadd.xlane.f32.xlu1 %v1810_v54 }
 0x4f2   :  { %1820 = vadd.xlane.f32.xlu0 %v1819_v44 }
 0x4f5   :  { %1931 = vadd.xlane.f32.xlu1 %v1930_v35 }
 0x4f6   :  { %1814 = vadd.xlane.f32.xlu0 %v1813_v58 }
 0x4f9   :  { %1937 = vadd.xlane.f32.xlu1 %v1936_v6 }
 0x4fa   :  { %1934 = vadd.xlane.f32.xlu0 %v1933_v16 }
 0x4fe   :  { %1940 = vadd.xlane.f32.xlu0 %v1939_v62 }
 0x547   :  { %v1782_v42 = vpop.xlane.xlu0 %1781 }
 0x549   :  { %v1902_v57 = vpop.xlane.xlu1 %1901 }
 0x54b   :  { %v1776_v12 = vpop.xlane.xlu0 %1775 }
 0x54d   :  { %v1896_v61 = vpop.xlane.xlu1 %1895 }
 0x54f   :  { %v1785_v31 = vpop.xlane.xlu0 %1784 }
 0x550   :  { %v1829_v37 = vadd.f32 %v1785_v31, %v1782_v42 }
 0x551   :  { %v1779_v7 = vpop.xlane.xlu1 %1778 }
 0x552   :  { %v1830_v25 = vrot.slane %v1829_v37, 4  ;;  %v1822_v14 = vadd.f32 %v1779_v7, %v1776_v12 }
 0x553   :  { %v1905_v41 = vpop.xlane.xlu0 %1904 }
 0x554   :  { %v1831_v51 = vadd.f32 %v1830_v25, %v1829_v37  ;;  %v1823_v56 = vrot.slane %v1822_v14, 4  ;;  %v1949_v32 = vadd.f32 %v1905_v41, %v1902_v57 }
 0x556   :  { %v1832_v18 = vrot.slane %v1831_v51, 2  ;;  %v1824_v4 = vadd.f32 %v1823_v56, %v1822_v14  ;;  %v1950_v29 = vrot.slane %v1949_v32, 4  ;;  %v1794_v46 = vpop.xlane.xlu1 %1793 }
 0x557   :  { %v1899_v39 = vpop.xlane.xlu0 %1898 }
 0x558   :  { %v1833_v48 = vadd.f32 %v1832_v18, %v1831_v51  ;;  %v1825_v1 = vrot.slane %v1824_v4, 2  ;;  %v1951_v9 = vadd.f32 %v1950_v29, %v1949_v32  ;;  %v1942_v55 = vadd.f32 %v1899_v39, %v1896_v61 }
 0x55a   :  { %v1834_v47 = vrot.slane %v1833_v48, 1  ;;  %v1826_v38 = vadd.f32 %v1825_v1, %v1824_v4  ;;  %v1952_v34 = vrot.slane %v1951_v9, 2  ;;  %v1943_v20 = vrot.slane %v1942_v55, 4  ;;  %v1788_v10 = vpop.xlane.xlu1 %1787 }
 0x55b   :  { %v1797_v30 = vpop.xlane.xlu0 %1796 }
 0x55c   :  { %v1835_v45 = vadd.f32 %v1834_v47, %v1833_v48  ;;  %v1827_v50 = vrot.slane %v1826_v38, 1  ;;  %v1953_v15 = vadd.f32 %v1952_v34, %v1951_v9  ;;  %v1944_v52 = vadd.f32 %v1943_v20, %v1942_v55 }
 0x55d   :  { %v1843_v13 = vadd.f32 %v1797_v30, %v1794_v46 }
 0x55e   :  { %v3892_v27 = vmul.f32 0.00390625, %v1835_v45  ;;  %v1828_v24 = vadd.f32 %v1827_v50, %v1826_v38  ;;  %v1954_v5 = vrot.slane %v1953_v15, 1  ;;  %v1945_v54 = vrot.slane %v1944_v52, 2  ;;  %v1914_v60 = vpop.xlane.xlu1 %1913 }
 0x55f   :  { %v1844_v44 = vrot.slane %v1843_v13, 4  ;;  %v1791_v35 = vpop.xlane.xlu0 %1790 }
 0x560   :  { %v1955_v58 = vadd.f32 %v1954_v5, %v1953_v15  ;;  %v1946_v36 = vadd.f32 %v1945_v54, %v1944_v52  ;;  %v1836_v6 = vadd.f32 %v1791_v35, %v1788_v10  ;;  %v3894_v16 = vmul.f32 0.00390625, %v1828_v24 }
 0x561   :  { %v1845_v40 = vadd.f32 %v1844_v44, %v1843_v13  ;;  %v2015_v22 = vmul.f32 %v3892_v27, %v3892_v27 }
 0x562   :  { %v2007_v62 = vmul.f32 0.00390625, %v1955_v58  ;;  %v1947_v0 = vrot.slane %v1946_v36, 1  ;;  %v1837_v57 = vrot.slane %v1836_v6, 4  ;;  %v1908_v12 = vpop.xlane.xlu1 %1907  ;;  %v2014_v41 = vmul.f32 %v3894_v16, %v3894_v16 }
 0x563   :  { %v1846_v42 = vrot.slane %v1845_v40, 2  ;;  %v1917_v61 = vpop.xlane.xlu0 %1916 }
 0x564   :  { %v1963_v31 = vadd.f32 %v1917_v61, %v1914_v60  ;;  %v2023_v37 = vsub.f32 %v2007_v62, %v2015_v22  ;;  %v1948_v7 = vadd.f32 %v1947_v0, %v1946_v36  ;;  %v1838_v14 = vadd.f32 %v1837_v57, %v1836_v6 }
 0x565   :  { %v1847_v25 = vadd.f32 %v1846_v42, %v1845_v40 }
 0x566   :  { %v1964_v51 = vrot.slane %v1963_v31, 4  ;;  %v2047_v56 = vadd.f32 1e-05, %v2023_v37  ;;  %v2006_v32 = vmul.f32 0.00390625, %v1948_v7  ;;  %v1839_v4 = vrot.slane %v1838_v14, 2  ;;  %v1806_v29 = vpop.xlane.xlu1 %1805 }
 0x567   :  { %v1848_v18 = vrot.slane %v1847_v25, 1  ;;  %v1911_v46 = vpop.xlane.xlu0 %1910 }
 0x568   :  { %v1965_v39 = vadd.f32 %v1964_v51, %v1963_v31  ;;  %v1956_v48 = vadd.f32 %v1911_v46, %v1908_v12  ;;  %2735 = vrsqrt.f32 %v2047_v56  ;;  %v2022_v1 = vsub.f32 %v2006_v32, %v2014_v41 }
 0x569   :  { %v1849_v9 = vadd.f32 %v1848_v18, %v1847_v25  ;;  %v1840_v55 = vadd.f32 %v1839_v4, %v1838_v14  ;;  %v2032_v14 = vsub.f32 %v3762_v53, %v3892_v27  ;;  %v2033_v41 = vsub.f32 %v3775_v63, %v3892_v27 }
 0x56a   :  { %v1966_v47 = vrot.slane %v1965_v39, 2  ;;  %v1957_v38 = vrot.slane %v1956_v48, 4  ;;  %v2046_v34 = vadd.f32 1e-05, %v2022_v1  ;;  %v1800_v10 = vpop.xlane.xlu1 %1799 }
 0x56b   :  { %v1841_v20 = vrot.slane %v1840_v55, 1  ;;  %v1809_v30 = vpop.xlane.xlu0 %1808  ;;  %v3900_v52 = vmul.f32 0.00390625, %v1849_v9  ;;  %v3915_v9 = vld [vmem:[%s4063_s2 + $0x5] ss:$0 sm:$0xff] }
 0x56c   :  { %v1967_v45 = vadd.f32 %v1966_v47, %v1965_v39  ;;  %v1958_v50 = vadd.f32 %v1957_v38, %v1956_v48  ;;  %v1857_v15 = vadd.f32 %v1809_v30, %v1806_v29  ;;  %2737 = vrsqrt.f32 %v2046_v34 }
 0x56d   :  { %v1842_v13 = vadd.f32 %v1841_v20, %v1840_v55  ;;  %v2017_v22 = vmul.f32 %v3900_v52, %v3900_v52  ;;  %v2030_v38 = vsub.f32 %v3765_v59, %v3894_v16  ;;  %v2031_v34 = vsub.f32 %v3780_v49, %v3894_v16  ;;  %v3926_v59 = vld [vmem:[%s4063_s2 + $0x6] ss:$0 sm:$0xff] }
 0x56e   :  { %v1968_v24 = vrot.slane %v1967_v45, 1  ;;  %v1959_v5 = vrot.slane %v1958_v50, 2  ;;  %v1858_v54 = vrot.slane %v1857_v15, 4  ;;  %v1926_v44 = vpop.xlane.xlu1 %1925 }
 0x56f   :  { %v1803_v60 = vpop.xlane.xlu0 %1802  ;;  %v3902_v6 = vmul.f32 0.00390625, %v1842_v13 }
 0x570   :  { %v1969_v35 = vadd.f32 %v1968_v24, %v1967_v45  ;;  %v1960_v58 = vadd.f32 %v1959_v5, %v1958_v50  ;;  %v1859_v36 = vadd.f32 %v1858_v54, %v1857_v15  ;;  %v1850_v40 = vadd.f32 %v1803_v60, %v1800_v10 }
 0x571   :  { %v2016_v51 = vmul.f32 %v3902_v6, %v3902_v6 }
 0x572   :  { %v2009_v62 = vmul.f32 0.00390625, %v1969_v35  ;;  %v1961_v0 = vrot.slane %v1960_v58, 1  ;;  %v1860_v42 = vrot.slane %v1859_v36, 2  ;;  %v1851_v57 = vrot.slane %v1850_v40, 4  ;;  %v1920_v12 = vpop.xlane.xlu1 %1919 }
 0x573   :  { %v1929_v61 = vpop.xlane.xlu0 %1928 }
 0x574   :  { %v2025_v31 = vsub.f32 %v2009_v62, %v2017_v22  ;;  %v1962_v37 = vadd.f32 %v1961_v0, %v1960_v58  ;;  %v1861_v7 = vadd.f32 %v1860_v42, %v1859_v36  ;;  %v1852_v25 = vadd.f32 %v1851_v57, %v1850_v40 }
 0x575   :  { %v1977_v56 = vadd.f32 %v1929_v61, %v1926_v44  ;;  %v2736_v32 = vpop.eup %2735 }
 0x576   :  { %v2049_v18 = vadd.f32 1e-05, %v2025_v31  ;;  %v2008_v4 = vmul.f32 0.00390625, %v1962_v37  ;;  %v1862_v29 = vrot.slane %v1861_v7, 1  ;;  %v1853_v46 = vrot.slane %v1852_v25, 2  ;;  %v1818_v48 = vpop.xlane.xlu1 %1817 }
 0x577   :  { %v1978_v39 = vrot.slane %v1977_v56, 4  ;;  %v1923_v1 = vpop.xlane.xlu0 %1922  ;;  %v2064_v53 = vmul.f32 %v2736_v32, %v2032_v14  ;;  %v2065_v55 = vmul.f32 %v2736_v32, %v2033_v41  ;;  %v2036_v37 = vsub.f32 %v3793_v8, %v3900_v52 }
 0x578   :  { %2739 = vrsqrt.f32 %v2049_v18  ;;  %v2024_v63 = vsub.f32 %v2008_v4, %v2016_v51  ;;  %v1863_v27 = vadd.f32 %v1862_v29, %v1861_v7  ;;  %v1854_v47 = vadd.f32 %v1853_v46, %v1852_v25 }
 0x579   :  { %v1979_v20 = vadd.f32 %v1978_v39, %v1977_v56  ;;  %v1970_v10 = vadd.f32 %v1923_v1, %v1920_v12  ;;  %v2738_v30 = vpop.eup %2737  ;;  %v2085_v15 = vmul.f32 %v3915_v9, %v2064_v53  ;;  %v2086_v13 = vmul.f32 %v3915_v9, %v2065_v55 }
 0x57a   :  { %v2048_v45 = vadd.f32 1e-05, %v2024_v63  ;;  %v1855_v50 = vrot.slane %v1854_v47, 1  ;;  %v1812_v54 = vpop.xlane.xlu1 %1811  ;;  %v2062_v60 = vmul.f32 %v2738_v30, %v2030_v38  ;;  %v2063_v35 = vmul.f32 %v2738_v30, %v2031_v34 }
 0x57b   :  { %v1980_v24 = vrot.slane %v1979_v20, 2  ;;  %v1971_v5 = vrot.slane %v1970_v10, 4  ;;  %v1821_v44 = vpop.xlane.xlu0 %1820  ;;  %v3928_v49 = vmul.f32 0.00390625, %v1863_v27  ;;  %v2106_v0 = vadd.f32 %v3926_v59, %v2085_v15 }
 0x57c   :  { %2741 = vrsqrt.f32 %v2048_v45  ;;  %v1856_v16 = vadd.f32 %v1855_v50, %v1854_v47  ;;  %v1871_v40 = vadd.f32 %v1821_v44, %v1818_v48  ;;  %v2083_v22 = vmul.f32 %v3915_v9, %v2062_v60 }
 0x57d   :  { %v1981_v58 = vadd.f32 %v1980_v24, %v1979_v20  ;;  %v1972_v36 = vadd.f32 %v1971_v5, %v1970_v10  ;;  %v2084_v62 = vmul.f32 %v3915_v9, %v2063_v35  ;;  %v2107_v31 = vadd.f32 %v3926_v59, %v2086_v13 }
 0x57e   :  { %v1872_v12 = vrot.slane %v1871_v40, 4  ;;  %v3936_v7 = vmul.f32 0.00390625, %v1856_v16  ;;  %v2019_v25 = vmul.f32 %v3928_v49, %v3928_v49  ;;  %v1932_v32 = vpop.xlane.xlu1 %1931  ;;  %v2104_v18 = vadd.f32 %v3926_v59, %v2083_v22 }
 0x57f   :  { %v1982_v42 = vrot.slane %v1981_v58, 1  ;;  %v1973_v57 = vrot.slane %v1972_v36, 2  ;;  %v1815_v61 = vpop.xlane.xlu0 %1814  ;;  %v2105_v29 = vadd.f32 %v3926_v59, %v2084_v62  ;;  %v2122_v46 = vmax.f32 %v2106_v0, 0.0 }
 0x580   :  { %v1864_v14 = vadd.f32 %v1815_v61, %v1812_v54  ;;  %v1873_v56 = vadd.f32 %v1872_v12, %v1871_v40  ;;  %v2123_v39 = vmax.f32 %v2107_v31, 0.0  ;;  %v2120_v55 = vmax.f32 %v2104_v18, 0.0 }
 0x581   :  { %v1983_v41 = vadd.f32 %v1982_v42, %v1981_v58  ;;  %v1974_v51 = vadd.f32 %v1973_v57, %v1972_v36  ;;  %v2037_v63 = vsub.f32 %v3802_v3, %v3900_v52  ;;  %v2121_v38 = vmax.f32 %v2105_v29, 0.0 }
 0x582   :  { %v1865_v4 = vrot.slane %v1864_v14, 4  ;;  %v1874_v8 = vrot.slane %v1873_v56, 2  ;;  %v2018_v10 = vmul.f32 %v3936_v7, %v3936_v7  ;;  %v2137_v45 = vpack.c.bf16 %v2123_v39, %v2122_v46  ;;  %v1938_v60 = vpop.xlane.xlu1 %1937 }
 0x583   :  { %v2011_v48 = vmul.f32 0.00390625, %v1983_v41  ;;  %v1975_v1 = vrot.slane %v1974_v51, 1  ;;  %v1935_v53 = vpop.xlane.xlu0 %1934  ;;  %v2136_v13 = vpack.c.bf16 %v2121_v38, %v2120_v55  ;;  %v2034_v52 = vsub.f32 %v3796_v17, %v3902_v6 }
 0x584   :  { %v1866_v27 = vadd.f32 %v1865_v4, %v1864_v14  ;;  %v1984_v47 = vadd.f32 %v1935_v53, %v1932_v32  ;;  %v1875_v44 = vadd.f32 %v1874_v8, %v1873_v56  ;;  %v2035_v22 = vsub.f32 %v3805_v2, %v3902_v6 }
 0x585   :  { %v2740_v34 = vpop.eup %2739  ;;  %v2027_v20 = vsub.f32 %v2011_v48, %v2019_v25  ;;  %v1976_v30 = vadd.f32 %v1975_v1, %v1974_v51  ;;  %2451 = vmatprep.mubr.msk.bf16.mxu1 %vm789_vm7, %v2136_v13 }
 0x586   :  { %v1867_v50 = vrot.slane %v1866_v27, 2  ;;  %v1985_v15 = vrot.slane %v1984_v47, 4  ;;  %v2068_v24 = vmul.f32 %v2740_v34, %v2036_v37  ;;  %v2069_v3 = vmul.f32 %v2740_v34, %v2037_v63  ;;  %2452 = vmatmul.mubr.msk.bf16.vlgmr.msra.gmra.mxu1 %vm789_vm7, %v2137_v45 }
 0x587   :  { %v2051_v5 = vadd.f32 1e-05, %v2027_v20  ;;  %v2010_v54 = vmul.f32 0.00390625, %v1976_v30  ;;  %v1941_v35 = vpop.xlane.xlu0 %1940  ;;  %v1876_v31 = vrot.slane %v1875_v44, 1  ;;  %v2040_v30 = vsub.f32 %v3821_v43, %v3928_v49 }
 0x588   :  { %v1868_v16 = vadd.f32 %v1867_v50, %v1866_v27  ;;  %v1986_v58 = vadd.f32 %v1985_v15, %v1984_v47  ;;  %v1991_v36 = vadd.f32 %v1941_v35, %v1938_v60  ;;  %v2089_v0 = vmul.f32 %v3915_v9, %v2068_v24 }
 0x589   :  { %v2742_v40 = vpop.eup %2741  ;;  %2743 = vrsqrt.f32 %v2051_v5  ;;  %v2026_v62 = vsub.f32 %v2010_v54, %v2018_v10  ;;  %v2090_v25 = vmul.f32 %v3915_v9, %v2069_v3  ;;  %v1877_v29 = vadd.f32 %v1876_v31, %v1875_v44 }
 0x58a   :  { %v1869_v42 = vrot.slane %v1868_v16, 1  ;;  %v1987_v57 = vrot.slane %v1986_v58, 2  ;;  %v1992_v12 = vrot.slane %v1991_v36, 4  ;;  %v2066_v61 = vmul.f32 %v2742_v40, %v2034_v52 }
 0x58b   :  { %v2050_v17 = vadd.f32 1e-05, %v2026_v62  ;;  %v2067_v37 = vmul.f32 %v2742_v40, %v2035_v22  ;;  %v2110_v6 = vadd.f32 %v3926_v59, %v2089_v0  ;;  %v2111_v39 = vadd.f32 %v3926_v59, %v2090_v25 }
 0x58c   :  { %v1870_v14 = vadd.f32 %v1869_v42, %v1868_v16  ;;  %v1988_v41 = vadd.f32 %v1987_v57, %v1986_v58  ;;  %v1993_v51 = vadd.f32 %v1992_v12, %v1991_v36  ;;  %v2087_v2 = vmul.f32 %v3915_v9, %v2066_v61 }
 0x58d   :  { %2745 = vrsqrt.f32 %v2050_v17  ;;  %v2088_v4 = vmul.f32 %v3915_v9, %v2067_v37  ;;  %v2126_v27 = vmax.f32 %v2110_v6, 0.0  ;;  %v2127_v47 = vmax.f32 %v2111_v39, 0.0 }
 0x58e   :  { %v2004_v56 = vmul.f32 0.00390625, %v1870_v14  ;;  %v1989_v32 = vrot.slane %v1988_v41, 1  ;;  %v1994_v18 = vrot.slane %v1993_v51, 2  ;;  %v2108_v46 = vadd.f32 %v3926_v59, %v2087_v2 }
 0x58f   :  { %v2109_v8 = vadd.f32 %v3926_v59, %v2088_v4  ;;  %v2005_v38 = vmul.f32 0.00390625, %v1877_v29  ;;  %v2041_v45 = vsub.f32 %v3833_v19, %v3928_v49  ;;  %v2139_v5 = vpack.c.bf16 %v2127_v47, %v2126_v27  ;;  %v2343_v27 = vld [vmem:[%s4063_s2 + $0x7] ss:$0 sm:$0xff] }
 0x590   :  { %v1990_v48 = vadd.f32 %v1989_v32, %v1988_v41  ;;  %v1995_v1 = vadd.f32 %v1994_v18, %v1993_v51  ;;  %v2124_v53 = vmax.f32 %v2108_v46, 0.0  ;;  %v2020_v55 = vmul.f32 %v2004_v56, %v2004_v56 }
 0x591   :  { %v2125_v20 = vmax.f32 %v2109_v8, 0.0  ;;  %v2021_v54 = vmul.f32 %v2005_v38, %v2005_v38  ;;  %v2038_v3 = vsub.f32 %v3830_v23, %v3936_v7  ;;  %v2039_v43 = vsub.f32 %v3837_v26, %v3936_v7 }
 0x592   :  { %v2012_v63 = vmul.f32 0.00390625, %v1990_v48  ;;  %v1996_v34 = vrot.slane %v1995_v1, 1  ;;  %v2042_v31 = vsub.f32 %v3860_v11, %v2004_v56  ;;  %v2043_v37 = vsub.f32 %v3869_v21, %v2004_v56 }
 0x593   :  { %v2138_v15 = vpack.c.bf16 %v2125_v20, %v2124_v53  ;;  %v2044_v32 = vsub.f32 %v3853_v28, %v2005_v38  ;;  %v2045_v18 = vsub.f32 %v3863_v33, %v2005_v38 }
 0x594   :  { %v2028_v10 = vsub.f32 %v2012_v63, %v2020_v55  ;;  %v1997_v50 = vadd.f32 %v1996_v34, %v1995_v1 }
 0x595   :  { %2455 = vmatprep.mubr.msk.bf16.mxu1 %vm789_vm7, %v2138_v15 }
 0x596   :  { %v2744_v13 = vpop.eup %2743  ;;  %v2052_v24 = vadd.f32 1e-05, %v2028_v10  ;;  %v2013_v44 = vmul.f32 0.00390625, %v1997_v50  ;;  %2456 = vmatmul.mubr.msk.bf16.gmra.mxu1 %vm789_vm7, %v2139_v5 }
 0x597   :  { %v2072_v60 = vmul.f32 %v2744_v13, %v2040_v30  ;;  %v2073_v35 = vmul.f32 %v2744_v13, %v2041_v45 }
 0x598   :  { %2747 = vrsqrt.f32 %v2052_v24  ;;  %v2029_v19 = vsub.f32 %v2013_v44, %v2021_v54 }
 0x599   :  { %v2093_v49 = vmul.f32 %v3915_v9, %v2072_v60  ;;  %v2094_v52 = vmul.f32 %v3915_v9, %v2073_v35 }
 0x59a   :  { %v2746_v16 = vpop.eup %2745  ;;  %v2053_v58 = vadd.f32 1e-05, %v2029_v19 }
 0x59b   :  { %v2070_v36 = vmul.f32 %v2746_v16, %v2038_v3  ;;  %v2071_v40 = vmul.f32 %v2746_v16, %v2039_v43  ;;  %v2114_v22 = vadd.f32 %v3926_v59, %v2093_v49  ;;  %v2115_v62 = vadd.f32 %v3926_v59, %v2094_v52 }
 0x59c   :  { %2749 = vrsqrt.f32 %v2053_v58 }
 0x59d   :  { %v2091_v23 = vmul.f32 %v3915_v9, %v2070_v36  ;;  %v2092_v0 = vmul.f32 %v3915_v9, %v2071_v40  ;;  %v2130_v42 = vmax.f32 %v2114_v22, 0.0  ;;  %v2131_v57 = vmax.f32 %v2115_v62, 0.0 }
 0x59f   :  { %v2112_v26 = vadd.f32 %v3926_v59, %v2091_v23  ;;  %v2113_v7 = vadd.f32 %v3926_v59, %v2092_v0  ;;  %v2141_v25 = vpack.c.bf16 %v2131_v57, %v2130_v42 }
 0x5a1   :  { %v2128_v12 = vmax.f32 %v2112_v26, 0.0  ;;  %v2129_v61 = vmax.f32 %v2113_v7, 0.0 }
 0x5a3   :  { %v2140_v17 = vpack.c.bf16 %v2129_v61, %v2128_v12 }
 0x5a5   :  { %v2748_v14 = vpop.eup %2747  ;;  %2459 = vmatprep.mubr.msk.bf16.mxu1 %vm789_vm7, %v2140_v17 }
 0x5a6   :  { %2460 = vmatmul.mubr.msk.bf16.gmra.mxu1 %vm789_vm7, %v2141_v25  ;;  %v2074_v41 = vmul.f32 %v2748_v14, %v2042_v31  ;;  %v2075_v51 = vmul.f32 %v2748_v14, %v2043_v37 }
 0x5a8   :  { %v2095_v2 = vmul.f32 %v3915_v9, %v2074_v41  ;;  %v2096_v6 = vmul.f32 %v3915_v9, %v2075_v51 }
 0x5a9   :  { %v2750_v4 = vpop.eup %2749 }
 0x5aa   :  { %v2116_v11 = vadd.f32 %v3926_v59, %v2095_v2  ;;  %v2117_v21 = vadd.f32 %v3926_v59, %v2096_v6  ;;  %v2076_v56 = vmul.f32 %v2750_v4, %v2044_v32  ;;  %v2077_v29 = vmul.f32 %v2750_v4, %v2045_v18 }
 0x5ac   :  { %v2132_v46 = vmax.f32 %v2116_v11, 0.0  ;;  %v2133_v39 = vmax.f32 %v2117_v21, 0.0  ;;  %v2097_v48 = vmul.f32 %v3915_v9, %v2076_v56  ;;  %v2098_v1 = vmul.f32 %v3915_v9, %v2077_v29 }
 0x5ae   :  { %v2142_v8 = vpack.c.bf16 %v2133_v39, %v2132_v46  ;;  %v2118_v53 = vadd.f32 %v3926_v59, %v2097_v48  ;;  %v2119_v28 = vadd.f32 %v3926_v59, %v2098_v1 }
 0x5b0   :  { %2463 = vmatprep.mubr.msk.bf16.mxu1 %vm789_vm7, %v2142_v8  ;;  %v2134_v33 = vmax.f32 %v2118_v53, 0.0  ;;  %v2135_v55 = vmax.f32 %v2119_v28, 0.0 }
 0x5b2   :  { %v2143_v63 = vpack.c.bf16 %v2135_v55, %v2134_v33 }
 0x5b4   :  { %2464 = vmatmul.mubr.msk.bf16.gmra.mxu1 %vm789_vm7, %v2143_v63 }
 0x646   :  { %v2453_v47 = vpop.f32.mrf.mxu1 }
 0x647   :  { %v2225_v38 = vadd.f32 %v2453_v47, %v2343_v27 }
 0x648   :  { %v2216_v34 = vpop.f32.mrf.mxu1 }
 0x649   :  { %2281 = vst.msk [vmem:[%s4064_s3 + $0x10] sm:$0xff] %vm306_vm3, %v2225_v38  ;;  %v2217_v9 = vadd.f32 %v2343_v27, %v2216_v34 }
 0x64a   :  { %v2454_v59 = vpop.f32.mrf.mxu1 }
 0x64b   :  { %2279 = vst.msk [vmem:[%s4064_s3] sm:$0xff] %vm306_vm3, %v2217_v9  ;;  %v2228_v20 = vadd.f32 %v2454_v59, %v2343_v27 }
 0x64c   :  { %v2219_v10 = vpop.f32.mrf.mxu1 }
 0x64d   :  { %2282 = vst.msk [vmem:[%s4064_s3 + $0x18] sm:$0xff] %vm306_vm3, %v2228_v20  ;;  %v2220_v30 = vadd.f32 %v2343_v27, %v2219_v10 }
 0x64f   :  { %2280 = vst.msk [vmem:[%s4064_s3 + $0x8] sm:$0xff] %vm306_vm3, %v2220_v30 }
 0x656   :  { %v2457_v45 = vpop.f32.mrf.mxu1 }
 0x657   :  { %v2241_v50 = vadd.f32 %v2457_v45, %v2343_v27 }
 0x658   :  { %v2232_v15 = vpop.f32.mrf.mxu1 }
 0x659   :  { %2285 = vst.msk [vmem:[%s4064_s3 + $0x30] sm:$0xff] %vm306_vm3, %v2241_v50  ;;  %v2233_v13 = vadd.f32 %v2343_v27, %v2232_v15 }
 0x65a   :  { %v2458_v24 = vpop.f32.mrf.mxu1 }
 0x65b   :  { %2283 = vst.msk [vmem:[%s4064_s3 + $0x20] sm:$0xff] %vm306_vm3, %v2233_v13  ;;  %v2244_v5 = vadd.f32 %v2458_v24, %v2343_v27 }
 0x65c   :  { %v2235_v54 = vpop.f32.mrf.mxu1 }
 0x65d   :  { %2286 = vst.msk [vmem:[%s4064_s3 + $0x38] sm:$0xff] %vm306_vm3, %v2244_v5  ;;  %v2236_v44 = vadd.f32 %v2343_v27, %v2235_v54 }
 0x65f   :  { %2284 = vst.msk [vmem:[%s4064_s3 + $0x28] sm:$0xff] %vm306_vm3, %v2236_v44 }
 0x666   :  { %v2461_v60 = vpop.f32.mrf.mxu1 }
 0x667   :  { %v2257_v35 = vadd.f32 %v2461_v60, %v2343_v27 }
 0x668   :  { %v2248_v3 = vpop.f32.mrf.mxu1 }
 0x669   :  { %2289 = vst.msk [vmem:[%s4064_s3 + $0x50] sm:$0xff] %vm306_vm3, %v2257_v35  ;;  %v2249_v43 = vadd.f32 %v2343_v27, %v2248_v3 }
 0x66a   :  { %v2462_v19 = vpop.f32.mrf.mxu1 }
 0x66b   :  { %2287 = vst.msk [vmem:[%s4064_s3 + $0x40] sm:$0xff] %vm306_vm3, %v2249_v43  ;;  %v2260_v49 = vadd.f32 %v2462_v19, %v2343_v27 }
 0x66c   :  { %v2251_v52 = vpop.f32.mrf.mxu1 }
 0x66d   :  { %2290 = vst.msk [vmem:[%s4064_s3 + $0x58] sm:$0xff] %vm306_vm3, %v2260_v49  ;;  %v2252_v16 = vadd.f32 %v2343_v27, %v2251_v52 }
 0x66f   :  { %2288 = vst.msk [vmem:[%s4064_s3 + $0x48] sm:$0xff] %vm306_vm3, %v2252_v16 }
 0x674   :  { %v2465_v58 = vpop.f32.mrf.mxu1 }
 0x675   :  { %v2273_v36 = vadd.f32 %v2465_v58, %v2343_v27 }
 0x676   :  { %v2264_v40 = vpop.f32.mrf.mxu1 }
 0x677   :  { %2293 = vst.msk [vmem:[%s4064_s3 + $0x70] sm:$0xff] %vm306_vm3, %v2273_v36  ;;  %v2265_v22 = vadd.f32 %v2343_v27, %v2264_v40 }
 0x678   :  { %v2466_v62 = vpop.f32.mrf.mxu1 }
 0x679   :  { %2291 = vst.msk [vmem:[%s4064_s3 + $0x60] sm:$0xff] %vm306_vm3, %v2265_v22  ;;  %v2276_v23 = vadd.f32 %v2466_v62, %v2343_v27 }
 0x67a   :  { %v2267_v0 = vpop.f32.mrf.mxu1 }
 0x67b   :  { %2294 = vst.msk [vmem:[%s4064_s3 + $0x78] sm:$0xff] %vm306_vm3, %v2276_v23  ;;  %v2268_v26 = vadd.f32 %v2343_v27, %v2267_v0 }
 0x67d   :  { %2292 = vst.msk [vmem:[%s4064_s3 + $0x68] sm:$0xff] %vm306_vm3, %v2268_v26 }

</bundles_post_ra>
